<compile_context>
chip_gen: v6e
topology: v6e:2x2x1
jax: 0.10.0
libtpu: 0.0.40
codegen_flags: <defaults>
</compile_context>

<pallas_src>
import jax
import jax.numpy as jnp
from jax import lax
from jax.experimental import pallas as pl
from jax.experimental.pallas import tpu as pltpu


# ------------------------------ Pallas kernel -------------------------------


def lenet5_kernel(x_ref, bb1_ref, b1_ref, bb2_ref, b2_ref,
                  fw1_ref, fb1_ref, fw2_ref, fb2_ref, fw3_ref, fb3_ref,
                  o_ref):
    """Fused LeNet5 forward for one batch tile.

    x_ref   : (28, TN, 28)  bf16  images, layout (H, batch, W)
    bb1_ref : (140, 144)    bf16  conv1 wide-K banded weights, rows=(kh,wi), cols=(co,wo)
    bb2_ref : (720, 128)    bf16  conv2 banded weights (pool1 width-half + 0.25 folded in)
    fw1_ref : (512, 120)    bf16  fc1 (flatten + pool2 width-half + 0.25 folded in)
    fw3_ref : (84, 128)     bf16  fc3 zero-padded to 128 output lanes
    o_ref   : (TN, 128)     f32   padded logits (cols 10..127 are zero)
    """
    tn = x_ref.shape[1]
    f32 = jnp.float32
    bf16 = jnp.bfloat16

    x = x_ref[...]                                            # (28, TN, 28) bf16

    # ---- conv1 + bias + relu: one wide-K MXU matmul (K = 5*28 = 140) --------
    lhs1 = jnp.concatenate([x[kh:kh + 24] for kh in range(5)], axis=-1)
    z1 = jnp.dot(lhs1.reshape(24 * tn, 5 * 28), bb1_ref[...],
                 preferred_element_type=f32)
    z1 = jnp.maximum(z1 + b1_ref[...], 0.0)                   # (24*TN, 144)

    # ---- 2x2 avg-pool #1: height half here (VPU add on a leading axis);
    #      width half and the 0.25 scale are folded into bb2. -----------------
    z1 = z1.reshape(12, 2, tn, 6 * 24)
    u1 = (z1[:, 0] + z1[:, 1]).astype(bf16)                   # (12, TN, 144), cast once

    # ---- conv2 + bias + relu: one wide-K MXU matmul (K = 5*144 = 720) -------
    lhs2 = jnp.concatenate([u1[kh:kh + 8] for kh in range(5)], axis=-1)
    z2 = jnp.dot(lhs2.reshape(8 * tn, 5 * 144), bb2_ref[...],
                 preferred_element_type=f32)
    z2 = jnp.maximum(z2 + b2_ref[...], 0.0)                   # (8*TN, 128)

    # ---- 2x2 avg-pool #2: height half; width half + 0.25 folded into fw1 ----
    z2 = z2.reshape(4, 2, tn, 16 * 8)
    u2 = z2[:, 0] + z2[:, 1]                                  # (4, TN, 128)

    # ---- flatten (128-aligned lane concat) + fused MLP head -----------------
    flat = jnp.concatenate([u2[h] for h in range(4)], axis=-1).astype(bf16)  # (TN, 512)
    h1 = jnp.dot(flat, fw1_ref[...], preferred_element_type=f32) + fb1_ref[...]
    h1 = jnp.maximum(h1, 0.0)
    h2 = jnp.dot(h1.astype(bf16), fw2_ref[...], preferred_element_type=f32) + fb2_ref[...]
    h2 = jnp.maximum(h2, 0.0)
    o_ref[...] = (jnp.dot(h2.astype(bf16), fw3_ref[...], preferred_element_type=f32)
                  + fb3_ref[...])


# ------------------- one-time weight restructuring (XLA) --------------------


def _band_matrix(w, w_in, pooled_input, dtype):
    """Banded matrix so a width-direction 'valid' conv becomes one matmul.

    Rows are (ci, wi) per kernel-row kh (leading axis), columns are (co, wo).
    If pooled_input, the previous layer's 2x2 avg-pool width half and the 0.25
    scale are folded in: wi indexes the UN-pooled width and wi//2 is the pooled
    column actually convolved.
    """
    co_n, ci_n, kh_n, kw_n = w.shape
    if pooled_input:
        w_cols = jnp.arange(w_in) // 2
        w_eff = w_in // 2
        scale = 0.25
    else:
        w_cols = jnp.arange(w_in)
        w_eff = w_in
        scale = 1.0
    w_out = w_eff - kw_n + 1
    kw_idx = w_cols[:, None] - jnp.arange(w_out)[None, :]          # (w_in, w_out)
    valid = (kw_idx >= 0) & (kw_idx < kw_n)
    kw_safe = jnp.clip(kw_idx, 0, kw_n - 1)
    wt = jnp.transpose(w, (2, 1, 3, 0))                            # (kh, ci, kw, co)
    b = jnp.take(wt, kw_safe, axis=2)                              # (kh, ci, w_in, w_out, co)
    b = jnp.where(valid[None, None, :, :, None], b, 0.0) * scale
    b = jnp.transpose(b, (0, 1, 2, 4, 3))                          # (kh, ci, w_in, co, w_out)
    return b.reshape(kh_n, ci_n * w_in, co_n * w_out).astype(dtype)


def _fc1_folded(fw1, dtype):
    """fc1 weight with PyTorch's (c, h, w) flatten + pool2 width half folded in.

    Kernel feature order is lane = h*(16*8) + c*8 + wo, wo = un-pooled conv2
    output column (wo // 2 is the pooled column PyTorch sees).
    """
    w = fw1.reshape(-1, 16, 4, 4)                 # (j, c, h, wp)
    w = jnp.transpose(w, (2, 1, 3, 0))            # (h, c, wp, j)
    w = jnp.repeat(w, 2, axis=2)                  # (h, c, wo=8, j)
    return (0.25 * w).reshape(4 * 16 * 8, -1).astype(dtype)


def _lane_bias(b, repeat_w):
    """Per-channel bias expanded to the (co, wo) lane layout."""
    return jnp.repeat(b, repeat_w)[None, :].astype(jnp.float32)


def pack_lenet5_params(params, dtype=jnp.bfloat16):
    """Precompute all kernel-side weight layouts ONCE (cache outside the jit)."""
    (w1, b1, w2, b2, fw1, fb1, fw2, fb2, fw3, fb3) = params
    bb1 = _band_matrix(w1, 28, pooled_input=False, dtype=dtype).reshape(5 * 28, 6 * 24)
    bb2 = _band_matrix(w2, 24, pooled_input=True, dtype=dtype).reshape(5 * 144, 16 * 8)
    b1l = _lane_bias(b1, 24)                                       # (1, 144)
    b2l = _lane_bias(b2, 8)                                        # (1, 128)
    fw1f = _fc1_folded(fw1, dtype)                                 # (512, 120)
    fw2t = fw2.T.astype(dtype)                                     # (120, 84)
    fw3p = jnp.zeros((84, 128), dtype).at[:, :10].set(fw3.T.astype(dtype))
    fb1l = fb1[None, :].astype(jnp.float32)
    fb2l = fb2[None, :].astype(jnp.float32)
    fb3p = jnp.zeros((1, 128), jnp.float32).at[:, :10].set(fb3[None, :].astype(jnp.float32))
    return (bb1, b1l, bb2, b2l, fw1f, fb1l, fw2t, fb2l, fw3p, fb3p)


def _whole_spec(a):
    nd = a.ndim
    return pl.BlockSpec(a.shape, lambda i: (0,) * nd)


def _pick_tile_n(batch, max_tile=128):
    """Batch tile: multiple of 16 (bf16 sublane packing), capped at max_tile
    (v7x VMEM), and shrunk so the grid has >= 2 steps when the batch allows
    (megacore sharding + DMA pipelining)."""
    n16 = max(16, ((batch + 15) // 16) * 16)
    tile = min(max_tile, n16)
    if n16 > 16 and (n16 + tile - 1) // tile < 2:
        tile = max(16, -(-(n16 // 2) // 16) * 16)
    return tile


# --------------------------------- wrapper ----------------------------------


def lenet5_pallas(x, packed, max_tile=128):
    """x: (N, 1, 28, 28) f32 (PyTorch NCHW). packed: pack_lenet5_params(...).
    Returns (N, 10) logits."""
    n0 = x.shape[0]
    tile = _pick_tile_n(n0, max_tile)
    n = ((n0 + tile - 1) // tile) * tile

    xs = x.reshape(n0, 28, 28).astype(jnp.bfloat16)      # cast fused into transpose
    if n != n0:
        xs = jnp.pad(xs, ((0, n - n0), (0, 0), (0, 0)))
    xs = jnp.transpose(xs, (1, 0, 2))                    # (28, N, 28): (H, batch, W)

    # Advisory cost estimate so XLA overlaps the wrapper ops with the call.
    flops = 2 * n * (24 * 140 * 144 + 8 * 720 * 128 + 512 * 120 + 120 * 84 + 84 * 128)
    bytes_w = sum(int(a.size) * a.dtype.itemsize for a in packed)
    cost = pl.CostEstimate(flops=flops, transcendentals=0,
                           bytes_accessed=int(xs.size) * 2 + bytes_w + n * 128 * 4)

    out = pl.pallas_call(
        lenet5_kernel,
        out_shape=jax.ShapeDtypeStruct((n, 128), jnp.float32),
        grid=(n // tile,),
        in_specs=[pl.BlockSpec((28, tile, 28), lambda i: (0, i, 0))]
                 + [_whole_spec(a) for a in packed],
        out_specs=pl.BlockSpec((tile, 128), lambda i: (i, 0)),
        compiler_params=pltpu.CompilerParams(
            dimension_semantics=("parallel",)),
        cost_estimate=cost,
    )(xs, *packed)
    return out[:n0, :10]


# ---------------------------- pure-JAX reference ----------------------------


def lenet5_reference(x, params):
    (w1, b1, w2, b2, fw1, fb1, fw2, fb2, fw3, fb3) = params

    def conv(v, w, b):
        y = lax.conv_general_dilated(
            v, w, (1, 1), "VALID", dimension_numbers=("NCHW", "OIHW", "NCHW"))
        return y + b[None, :, None, None]

    def pool(v):
        nb, c, h, w = v.shape
        return v.reshape(nb, c, h // 2, 2, w // 2, 2).mean(axis=(3, 5))

    y = pool(jax.nn.relu(conv(x, w1, b1)))
    y = pool(jax.nn.relu(conv(y, w2, b2)))
    y = y.reshape(y.shape[0], -1)
    y = jax.nn.relu(y @ fw1.T + fb1)
    y = jax.nn.relu(y @ fw2.T + fb2)
    return y @ fw3.T + fb3


# ----------------------------------- main -----------------------------------

if __name__ == "__main__":
    key = jax.random.PRNGKey(0)
    ks = jax.random.split(key, 11)

    def rnd(k, shape, scale=0.1):
        return scale * jax.random.normal(k, shape, dtype=jnp.float32)

    params = (
        rnd(ks[0], (6, 1, 5, 5)),       # conv1 weight
        rnd(ks[1], (6,)),               # conv1 bias
        rnd(ks[2], (16, 6, 5, 5)),      # conv2 weight
        rnd(ks[3], (16,)),              # conv2 bias
        rnd(ks[4], (120, 256)),         # fc1 weight (16*4*4 = 256 -> 28x28 inputs)
        rnd(ks[5], (120,)),             # fc1 bias
        rnd(ks[6], (84, 120)),          # fc2 weight
        rnd(ks[7], (84,)),              # fc2 bias
        rnd(ks[8], (10, 84)),           # fc3 weight
        rnd(ks[9], (10,)),              # fc3 bias
    )

    # LeNet5's fc1 (16*4*4) implies 28x28 inputs; batch 32 -> tile 16, grid of 2.
    x = jax.random.normal(ks[10], (32, 1, 28, 28), dtype=jnp.float32)

    # Pack weights ONCE, outside the jitted forward (review item).
    packed = jax.block_until_ready(pack_lenet5_params(params))

    fwd = jax.jit(lenet5_pallas)
    out = jax.block_until_ready(fwd(x, packed))

    ref = lenet5_reference(x, params)
    assert out.shape == (32, 10), out.shape
    assert bool(jnp.all(jnp.isfinite(out)))
    err = float(jnp.max(jnp.abs(out - ref)))
    # bf16 matmul operands with f32 accumulation -> small, bounded error.
    assert bool(jnp.allclose(out, ref, rtol=3e-2, atol=3e-3)), (
        "max abs err = %e" % err)

    print("KERNEL_OK")
</pallas_src>

<mosaic_0001>
module attributes {stable_mosaic.version = 11 : i64} {
  func.func @lenet5_kernel(%arg0: i32, %arg1: memref<28x16x28xbf16, #tpu.memory_space<vmem>>, %arg2: memref<140x144xbf16, #tpu.memory_space<vmem>>, %arg3: memref<1x144xf32, #tpu.memory_space<vmem>>, %arg4: memref<720x128xbf16, #tpu.memory_space<vmem>>, %arg5: memref<1x128xf32, #tpu.memory_space<vmem>>, %arg6: memref<512x120xbf16, #tpu.memory_space<vmem>>, %arg7: memref<1x120xf32, #tpu.memory_space<vmem>>, %arg8: memref<120x84xbf16, #tpu.memory_space<vmem>>, %arg9: memref<1x84xf32, #tpu.memory_space<vmem>>, %arg10: memref<84x128xbf16, #tpu.memory_space<vmem>>, %arg11: memref<1x128xf32, #tpu.memory_space<vmem>>, %arg12: memref<16x128xf32, #tpu.memory_space<vmem>>) attributes {dimension_semantics = [#tpu.dimension_semantics<parallel>], iteration_bounds = array<i64: 2>, scalar_prefetch = 0 : i64, scratch_operands = 0 : i64, tpu.core_type = #tpu.core_type<tc>, window_params = [{transform_indices = @transform_0, window_bounds = array<i64: 28, 16, 28>}, {pipeline_mode = #tpu.pipeline_mode<synchronous>, transform_indices = @transform_1, window_bounds = array<i64: 140, 144>}, {pipeline_mode = #tpu.pipeline_mode<synchronous>, transform_indices = @transform_2, window_bounds = array<i64: 1, 144>}, {pipeline_mode = #tpu.pipeline_mode<synchronous>, transform_indices = @transform_3, window_bounds = array<i64: 720, 128>}, {pipeline_mode = #tpu.pipeline_mode<synchronous>, transform_indices = @transform_4, window_bounds = array<i64: 1, 128>}, {pipeline_mode = #tpu.pipeline_mode<synchronous>, transform_indices = @transform_5, window_bounds = array<i64: 512, 120>}, {pipeline_mode = #tpu.pipeline_mode<synchronous>, transform_indices = @transform_6, window_bounds = array<i64: 1, 120>}, {pipeline_mode = #tpu.pipeline_mode<synchronous>, transform_indices = @transform_7, window_bounds = array<i64: 120, 84>}, {pipeline_mode = #tpu.pipeline_mode<synchronous>, transform_indices = @transform_8, window_bounds = array<i64: 1, 84>}, {pipeline_mode = #tpu.pipeline_mode<synchronous>, transform_indices = @transform_9, window_bounds = array<i64: 84, 128>}, {pipeline_mode = #tpu.pipeline_mode<synchronous>, transform_indices = @transform_10, window_bounds = array<i64: 1, 128>}, {transform_indices = @transform_11, window_bounds = array<i64: 16, 128>}]} {
    %c0 = arith.constant 0 : index
    %c0_0 = arith.constant 0 : index
    %c0_1 = arith.constant 0 : index
    %0 = vector.load %arg1[%c0, %c0_0, %c0_1] : memref<28x16x28xbf16, #tpu.memory_space<vmem>>, vector<28x16x28xbf16>
    %1 = vector.extract_strided_slice %0 {offsets = [0, 0, 0], sizes = [24, 16, 28], strides = [1, 1, 1]} : vector<28x16x28xbf16> to vector<24x16x28xbf16>
    %2 = vector.extract_strided_slice %0 {offsets = [1, 0, 0], sizes = [24, 16, 28], strides = [1, 1, 1]} : vector<28x16x28xbf16> to vector<24x16x28xbf16>
    %3 = vector.extract_strided_slice %0 {offsets = [2, 0, 0], sizes = [24, 16, 28], strides = [1, 1, 1]} : vector<28x16x28xbf16> to vector<24x16x28xbf16>
    %4 = vector.extract_strided_slice %0 {offsets = [3, 0, 0], sizes = [24, 16, 28], strides = [1, 1, 1]} : vector<28x16x28xbf16> to vector<24x16x28xbf16>
    %5 = vector.extract_strided_slice %0 {offsets = [4, 0, 0], sizes = [24, 16, 28], strides = [1, 1, 1]} : vector<28x16x28xbf16> to vector<24x16x28xbf16>
    %6 = tpu.concatenate %1, %2, %3, %4, %5 in 2 : vector<24x16x28xbf16>, vector<24x16x28xbf16>, vector<24x16x28xbf16>, vector<24x16x28xbf16>, vector<24x16x28xbf16> -> vector<24x16x140xbf16>
    %7 = vector.shape_cast %6 : vector<24x16x140xbf16> to vector<384x140xbf16>
    %c0_2 = arith.constant 0 : index
    %c0_3 = arith.constant 0 : index
    %8 = vector.load %arg2[%c0_2, %c0_3] : memref<140x144xbf16, #tpu.memory_space<vmem>>, vector<140x144xbf16>
    %cst = arith.constant dense<0.000000e+00> : vector<384x144xf32>
    %9 = tpu.matmul %7, %8, %cst {dimension_numbers = #tpu.dot_dimension_numbers<[1], [0], [0], [1], [0, 0, 1, 1], [], []>} : vector<384x140xbf16>, vector<140x144xbf16>, vector<384x144xf32> -> vector<384x144xf32>
    %c0_4 = arith.constant 0 : index
    %c0_5 = arith.constant 0 : index
    %10 = vector.load %arg3[%c0_4, %c0_5] : memref<1x144xf32, #tpu.memory_space<vmem>>, vector<1x144xf32>
    %11 = vector.broadcast %10 : vector<1x144xf32> to vector<384x144xf32>
    %12 = arith.addf %9, %11 : vector<384x144xf32>
    %cst_6 = arith.constant 0.000000e+00 : f32
    %13 = vector.broadcast %cst_6 : f32 to vector<384x144xf32>
    %14 = arith.maximumf %12, %13 : vector<384x144xf32>
    %15 = vector.shape_cast %14 : vector<384x144xf32> to vector<12x2x16x144xf32>
    %16 = vector.extract_strided_slice %15 {offsets = [0, 0, 0, 0], sizes = [12, 1, 16, 144], strides = [1, 1, 1, 1]} : vector<12x2x16x144xf32> to vector<12x1x16x144xf32>
    %17 = vector.shape_cast %16 : vector<12x1x16x144xf32> to vector<12x16x144xf32>
    %18 = vector.extract_strided_slice %15 {offsets = [0, 1, 0, 0], sizes = [12, 1, 16, 144], strides = [1, 1, 1, 1]} : vector<12x2x16x144xf32> to vector<12x1x16x144xf32>
    %19 = vector.shape_cast %18 : vector<12x1x16x144xf32> to vector<12x16x144xf32>
    %20 = arith.addf %17, %19 : vector<12x16x144xf32>
    %21 = arith.truncf %20 : vector<12x16x144xf32> to vector<12x16x144xbf16>
    %22 = vector.extract_strided_slice %21 {offsets = [0, 0, 0], sizes = [8, 16, 144], strides = [1, 1, 1]} : vector<12x16x144xbf16> to vector<8x16x144xbf16>
    %23 = vector.extract_strided_slice %21 {offsets = [1, 0, 0], sizes = [8, 16, 144], strides = [1, 1, 1]} : vector<12x16x144xbf16> to vector<8x16x144xbf16>
    %24 = vector.extract_strided_slice %21 {offsets = [2, 0, 0], sizes = [8, 16, 144], strides = [1, 1, 1]} : vector<12x16x144xbf16> to vector<8x16x144xbf16>
    %25 = vector.extract_strided_slice %21 {offsets = [3, 0, 0], sizes = [8, 16, 144], strides = [1, 1, 1]} : vector<12x16x144xbf16> to vector<8x16x144xbf16>
    %26 = vector.extract_strided_slice %21 {offsets = [4, 0, 0], sizes = [8, 16, 144], strides = [1, 1, 1]} : vector<12x16x144xbf16> to vector<8x16x144xbf16>
    %27 = tpu.concatenate %22, %23, %24, %25, %26 in 2 : vector<8x16x144xbf16>, vector<8x16x144xbf16>, vector<8x16x144xbf16>, vector<8x16x144xbf16>, vector<8x16x144xbf16> -> vector<8x16x720xbf16>
    %28 = vector.shape_cast %27 : vector<8x16x720xbf16> to vector<128x720xbf16>
    %c0_7 = arith.constant 0 : index
    %c0_8 = arith.constant 0 : index
    %29 = vector.load %arg4[%c0_7, %c0_8] : memref<720x128xbf16, #tpu.memory_space<vmem>>, vector<720x128xbf16>
    %cst_9 = arith.constant dense<0.000000e+00> : vector<128x128xf32>
    %30 = tpu.matmul %28, %29, %cst_9 {dimension_numbers = #tpu.dot_dimension_numbers<[1], [0], [0], [1], [0, 0, 1, 1], [], []>} : vector<128x720xbf16>, vector<720x128xbf16>, vector<128x128xf32> -> vector<128x128xf32>
    %c0_10 = arith.constant 0 : index
    %c0_11 = arith.constant 0 : index
    %31 = vector.load %arg5[%c0_10, %c0_11] : memref<1x128xf32, #tpu.memory_space<vmem>>, vector<1x128xf32>
    %32 = vector.broadcast %31 : vector<1x128xf32> to vector<128x128xf32>
    %33 = arith.addf %30, %32 : vector<128x128xf32>
    %cst_12 = arith.constant 0.000000e+00 : f32
    %34 = vector.broadcast %cst_12 : f32 to vector<128x128xf32>
    %35 = arith.maximumf %33, %34 : vector<128x128xf32>
    %36 = vector.shape_cast %35 : vector<128x128xf32> to vector<4x2x16x128xf32>
    %37 = vector.extract_strided_slice %36 {offsets = [0, 0, 0, 0], sizes = [4, 1, 16, 128], strides = [1, 1, 1, 1]} : vector<4x2x16x128xf32> to vector<4x1x16x128xf32>
    %38 = vector.shape_cast %37 : vector<4x1x16x128xf32> to vector<4x16x128xf32>
    %39 = vector.extract_strided_slice %36 {offsets = [0, 1, 0, 0], sizes = [4, 1, 16, 128], strides = [1, 1, 1, 1]} : vector<4x2x16x128xf32> to vector<4x1x16x128xf32>
    %40 = vector.shape_cast %39 : vector<4x1x16x128xf32> to vector<4x16x128xf32>
    %41 = arith.addf %38, %40 : vector<4x16x128xf32>
    %42 = vector.extract_strided_slice %41 {offsets = [0, 0, 0], sizes = [1, 16, 128], strides = [1, 1, 1]} : vector<4x16x128xf32> to vector<1x16x128xf32>
    %43 = vector.shape_cast %42 : vector<1x16x128xf32> to vector<16x128xf32>
    %44 = vector.extract_strided_slice %41 {offsets = [1, 0, 0], sizes = [1, 16, 128], strides = [1, 1, 1]} : vector<4x16x128xf32> to vector<1x16x128xf32>
    %45 = vector.shape_cast %44 : vector<1x16x128xf32> to vector<16x128xf32>
    %46 = vector.extract_strided_slice %41 {offsets = [2, 0, 0], sizes = [1, 16, 128], strides = [1, 1, 1]} : vector<4x16x128xf32> to vector<1x16x128xf32>
    %47 = vector.shape_cast %46 : vector<1x16x128xf32> to vector<16x128xf32>
    %48 = vector.extract_strided_slice %41 {offsets = [3, 0, 0], sizes = [1, 16, 128], strides = [1, 1, 1]} : vector<4x16x128xf32> to vector<1x16x128xf32>
    %49 = vector.shape_cast %48 : vector<1x16x128xf32> to vector<16x128xf32>
    %50 = tpu.concatenate %43, %45, %47, %49 in 1 : vector<16x128xf32>, vector<16x128xf32>, vector<16x128xf32>, vector<16x128xf32> -> vector<16x512xf32>
    %51 = arith.truncf %50 : vector<16x512xf32> to vector<16x512xbf16>
    %c0_13 = arith.constant 0 : index
    %c0_14 = arith.constant 0 : index
    %52 = vector.load %arg6[%c0_13, %c0_14] : memref<512x120xbf16, #tpu.memory_space<vmem>>, vector<512x120xbf16>
    %cst_15 = arith.constant dense<0.000000e+00> : vector<16x120xf32>
    %53 = tpu.matmul %51, %52, %cst_15 {dimension_numbers = #tpu.dot_dimension_numbers<[1], [0], [0], [1], [0, 0, 1, 1], [], []>} : vector<16x512xbf16>, vector<512x120xbf16>, vector<16x120xf32> -> vector<16x120xf32>
    %c0_16 = arith.constant 0 : index
    %c0_17 = arith.constant 0 : index
    %54 = vector.load %arg7[%c0_16, %c0_17] : memref<1x120xf32, #tpu.memory_space<vmem>>, vector<1x120xf32>
    %55 = vector.broadcast %54 : vector<1x120xf32> to vector<16x120xf32>
    %56 = arith.addf %53, %55 : vector<16x120xf32>
    %cst_18 = arith.constant 0.000000e+00 : f32
    %57 = vector.broadcast %cst_18 : f32 to vector<16x120xf32>
    %58 = arith.maximumf %56, %57 : vector<16x120xf32>
    %59 = arith.truncf %58 : vector<16x120xf32> to vector<16x120xbf16>
    %c0_19 = arith.constant 0 : index
    %c0_20 = arith.constant 0 : index
    %60 = vector.load %arg8[%c0_19, %c0_20] : memref<120x84xbf16, #tpu.memory_space<vmem>>, vector<120x84xbf16>
    %cst_21 = arith.constant dense<0.000000e+00> : vector<16x84xf32>
    %61 = tpu.matmul %59, %60, %cst_21 {dimension_numbers = #tpu.dot_dimension_numbers<[1], [0], [0], [1], [0, 0, 1, 1], [], []>} : vector<16x120xbf16>, vector<120x84xbf16>, vector<16x84xf32> -> vector<16x84xf32>
    %c0_22 = arith.constant 0 : index
    %c0_23 = arith.constant 0 : index
    %62 = vector.load %arg9[%c0_22, %c0_23] : memref<1x84xf32, #tpu.memory_space<vmem>>, vector<1x84xf32>
    %63 = vector.broadcast %62 : vector<1x84xf32> to vector<16x84xf32>
    %64 = arith.addf %61, %63 : vector<16x84xf32>
    %cst_24 = arith.constant 0.000000e+00 : f32
    %65 = vector.broadcast %cst_24 : f32 to vector<16x84xf32>
    %66 = arith.maximumf %64, %65 : vector<16x84xf32>
    %67 = arith.truncf %66 : vector<16x84xf32> to vector<16x84xbf16>
    %c0_25 = arith.constant 0 : index
    %c0_26 = arith.constant 0 : index
    %68 = vector.load %arg10[%c0_25, %c0_26] : memref<84x128xbf16, #tpu.memory_space<vmem>>, vector<84x128xbf16>
    %cst_27 = arith.constant dense<0.000000e+00> : vector<16x128xf32>
    %69 = tpu.matmul %67, %68, %cst_27 {dimension_numbers = #tpu.dot_dimension_numbers<[1], [0], [0], [1], [0, 0, 1, 1], [], []>} : vector<16x84xbf16>, vector<84x128xbf16>, vector<16x128xf32> -> vector<16x128xf32>
    %c0_28 = arith.constant 0 : index
    %c0_29 = arith.constant 0 : index
    %70 = vector.load %arg11[%c0_28, %c0_29] : memref<1x128xf32, #tpu.memory_space<vmem>>, vector<1x128xf32>
    %71 = vector.broadcast %70 : vector<1x128xf32> to vector<16x128xf32>
    %72 = arith.addf %69, %71 : vector<16x128xf32>
    %c0_30 = arith.constant 0 : index
    %c0_31 = arith.constant 0 : index
    %73 = vector.load %arg12[%c0_30, %c0_31] : memref<16x128xf32, #tpu.memory_space<vmem>>, vector<16x128xf32>
    tpu.vector_store %arg12[%c0_30, %c0_31], %72 {strides = array<i32>} : memref<16x128xf32, #tpu.memory_space<vmem>>, vector<16x128xf32>,
    return
  }
  func.func @transform_0(%arg0: i32) -> (i32, i32, i32) {
    %c0_i32 = arith.constant 0 : i32
    %c0_i32_0 = arith.constant 0 : i32
    %c0_i32_1 = arith.constant 0 : i32
    return %c0_i32, %arg0, %c0_i32_0 : i32, i32, i32
  }
  func.func @transform_1(%arg0: i32) -> (i32, i32) {
    %c0_i32 = arith.constant 0 : i32
    %c0_i32_0 = arith.constant 0 : i32
    %c0_i32_1 = arith.constant 0 : i32
    return %c0_i32, %c0_i32_0 : i32, i32
  }
  func.func @transform_2(%arg0: i32) -> (i32, i32) {
    %c0_i32 = arith.constant 0 : i32
    %c0_i32_0 = arith.constant 0 : i32
    %c0_i32_1 = arith.constant 0 : i32
    return %c0_i32, %c0_i32_0 : i32, i32
  }
  func.func @transform_3(%arg0: i32) -> (i32, i32) {
    %c0_i32 = arith.constant 0 : i32
    %c0_i32_0 = arith.constant 0 : i32
    %c0_i32_1 = arith.constant 0 : i32
    return %c0_i32, %c0_i32_0 : i32, i32
  }
  func.func @transform_4(%arg0: i32) -> (i32, i32) {
    %c0_i32 = arith.constant 0 : i32
    %c0_i32_0 = arith.constant 0 : i32
    %c0_i32_1 = arith.constant 0 : i32
    return %c0_i32, %c0_i32_0 : i32, i32
  }
  func.func @transform_5(%arg0: i32) -> (i32, i32) {
    %c0_i32 = arith.constant 0 : i32
    %c0_i32_0 = arith.constant 0 : i32
    %c0_i32_1 = arith.constant 0 : i32
    return %c0_i32, %c0_i32_0 : i32, i32
  }
  func.func @transform_6(%arg0: i32) -> (i32, i32) {
    %c0_i32 = arith.constant 0 : i32
    %c0_i32_0 = arith.constant 0 : i32
    %c0_i32_1 = arith.constant 0 : i32
    return %c0_i32, %c0_i32_0 : i32, i32
  }
  func.func @transform_7(%arg0: i32) -> (i32, i32) {
    %c0_i32 = arith.constant 0 : i32
    %c0_i32_0 = arith.constant 0 : i32
    %c0_i32_1 = arith.constant 0 : i32
    return %c0_i32, %c0_i32_0 : i32, i32
  }
  func.func @transform_8(%arg0: i32) -> (i32, i32) {
    %c0_i32 = arith.constant 0 : i32
    %c0_i32_0 = arith.constant 0 : i32
    %c0_i32_1 = arith.constant 0 : i32
    return %c0_i32, %c0_i32_0 : i32, i32
  }
  func.func @transform_9(%arg0: i32) -> (i32, i32) {
    %c0_i32 = arith.constant 0 : i32
    %c0_i32_0 = arith.constant 0 : i32
    %c0_i32_1 = arith.constant 0 : i32
    return %c0_i32, %c0_i32_0 : i32, i32
  }
  func.func @transform_10(%arg0: i32) -> (i32, i32) {
    %c0_i32 = arith.constant 0 : i32
    %c0_i32_0 = arith.constant 0 : i32
    %c0_i32_1 = arith.constant 0 : i32
    return %c0_i32, %c0_i32_0 : i32, i32
  }
  func.func @transform_11(%arg0: i32) -> (i32, i32) {
    %c0_i32 = arith.constant 0 : i32
    %c0_i32_0 = arith.constant 0 : i32
    return %arg0, %c0_i32 : i32, i32
  }
}

</mosaic_0001>

<bundles_post_ra>
// kernel: lenet5_pallas.1
= control target key start
LH: loop header
LB: loop body
LE: loop exit
PB: predicated region body
PF: predicated region fallthrough
CT: control target
= control target key end

     0   :  { %s4250_s17 = smov 0   ;;  %s4252_s18 = smov 0   ;;  %s5746_s0 = inlined_call_operand.vmem [shape: bf16[28,32,28], index: 0, kind: input, shape index: {}]   ;;  %s5747_s1 = inlined_call_operand.vmem [shape: bf16[140,144], index: 1, kind: input, shape index: {}]   ;;  %s5748_s2 = inlined_call_operand.vmem [shape: f32[1,144], index: 2, kind: input, shape index: {}]   ;;  %s5749_s3 = inlined_call_operand.vmem [shape: bf16[720,128], index: 3, kind: input, shape index: {}]   ;;  %s5750_s4 = inlined_call_operand.vmem [shape: f32[1,128], index: 4, kind: input, shape index: {}]   ;;  %s5751_s5 = inlined_call_operand.vmem [shape: bf16[512,120], index: 5, kind: input, shape index: {}]   ;;  %s5752_s6 = inlined_call_operand.vmem [shape: f32[1,120], index: 6, kind: input, shape index: {}]   ;;  %s5753_s7 = inlined_call_operand.vmem [shape: bf16[120,84], index: 7, kind: input, shape index: {}]   ;;  %s5754_s8 = inlined_call_operand.vmem [shape: f32[1,84], index: 8, kind: input, shape index: {}]   ;;  %s5755_s9 = inlined_call_operand.vmem [shape: bf16[84,128], index: 9, kind: input, shape index: {}]   ;;  %s5756_s10 = inlined_call_operand.vmem [shape: f32[1,128], index: 10, kind: input, shape index: {}]   ;;  %s5757_s11 = inlined_call_operand.vmem [shape: f32[32,128], index: 11, kind: output, shape index: {}]  }
   0x1   :  { %s4254_s19 = smov 0  }
   0x2 LB: > { %s3560_s20 = sadd.s32 4294967295, %s4177_s19   ;;  %s4267_s21 = sadd.s32 1, %s4177_s19   ;;  %s4177_s19 = sphi %s4254_s19, %s5760_s19   ;;  %s4173_s18 = sphi %s4252_s18, %s5759_s18   ;;  %s4169_s17 = sphi %s4250_s17, %s5758_s17  }
   0x3   : > { %s25_s22 = ssub.s32 %s4177_s19, %s4267_s21  ;;  %s28_s23 = sadd.s32 1, %s4173_s18 }
   0x4   : > { %p26_p0 = scmp.eq.s32.totalorder %s25_s22, 0  ;;  %p35_p1 = scmp.ne.s32.totalorder %s4173_s18, %s4169_s17 }
   0x5   : > { %p36_p2 = scmp.eq.s32.totalorder %s4177_s19, 0  ;;  %p3563_p4 = scmp.ge.s32.totalorder %s4177_s19, 2 }
   0x6   : > { %s4276_s24 = scalar_select %p26_p0, %s4173_s18, %s28_s23  }
   0x7   : > { %p37_p3 = por %p36_p2, %p35_p1  ;;  %327 = sbr.rel (%p3563_p4) target bundleno = 30 (0x1e), region = 56 }
   0xc   : > { %330 = sbr.rel (!%p37_p3) target bundleno = 30 (0x1e), region = 60  ;;  %s332_s25 = sand.u32 (%p37_p3), 1, %s4173_s18  }
   0xd   : > { %s3747_s26 = sshll.u32 (%p37_p3), %s4177_s19, 3  ;;  %s3972_s27 = smul.u32 (%p37_p3), 224, %s332_s25 }
   0xe   : > { %s4284_s30 = scalar_lea.vmem (%p37_p3), %s5746_s0, %s3747_s26 }
   0xf   : > { %v354_v0 = vld [vmem:[%s4284_s30] sm:$0xff] (%p37_p3)   ;;  %v358_v1 = vld [vmem:[%s4284_s30 + $0x10] sm:$0xff] (%p37_p3)   ;;  %s4292_s12 = scalar_lea.vmem (%p37_p3), [#allocation2], %s3972_s27 }
  0x10   : > { %v362_v2 = vld [vmem:[%s4284_s30 + $0x20] sm:$0xff] (%p37_p3)   ;;  %v366_v3 = vld [vmem:[%s4284_s30 + $0x30] sm:$0xff] (%p37_p3)   ;;  %355 = vst [vmem:[%s4292_s12] sm:$0xff] (%p37_p3), %v354_v0   ;;  %359 = vst [vmem:[%s4292_s12 + $0x8] sm:$0xff] (%p37_p3), %v358_v1  }
  0x11   : > { %v370_v4 = vld [vmem:[%s4284_s30 + $0x40] sm:$0xff]   ;;  %v374_v5 = vld [vmem:[%s4284_s30 + $0x50] sm:$0xff]   ;;  %363 = vst [vmem:[%s4292_s12 + $0x10] sm:$0xff] %v362_v2   ;;  %367 = vst [vmem:[%s4292_s12 + $0x18] sm:$0xff] %v366_v3  }
  0x12   : > { %371 = vst [vmem:[%s4292_s12 + $0x20] sm:$0xff] %v370_v4   ;;  %375 = vst [vmem:[%s4292_s12 + $0x28] sm:$0xff] %v374_v5   ;;  %v378_v6 = vld [vmem:[%s4284_s30 + $0x60] sm:$0xff]   ;;  %v382_v7 = vld [vmem:[%s4284_s30 + $0x70] sm:$0xff]  }
  0x13   : > { %v386_v8 = vld [vmem:[%s4284_s30 + $0x80] sm:$0xff]   ;;  %379 = vst [vmem:[%s4292_s12 + $0x30] sm:$0xff] %v378_v6   ;;  %383 = vst [vmem:[%s4292_s12 + $0x38] sm:$0xff] %v382_v7   ;;  %v390_v9 = vld [vmem:[%s4284_s30 + $0x90] sm:$0xff]  }
  0x14   : > { %387 = vst [vmem:[%s4292_s12 + $0x40] sm:$0xff] %v386_v8   ;;  %v394_v10 = vld [vmem:[%s4284_s30 + $0xa0] sm:$0xff]   ;;  %v398_v11 = vld [vmem:[%s4284_s30 + $0xb0] sm:$0xff]   ;;  %391 = vst [vmem:[%s4292_s12 + $0x48] sm:$0xff] %v390_v9  }
  0x15   : > { %395 = vst [vmem:[%s4292_s12 + $0x50] sm:$0xff] %v394_v10   ;;  %399 = vst [vmem:[%s4292_s12 + $0x58] sm:$0xff] %v398_v11   ;;  %v402_v12 = vld [vmem:[%s4284_s30 + $0xc0] sm:$0xff]   ;;  %v406_v13 = vld [vmem:[%s4284_s30 + $0xd0] sm:$0xff]  }
  0x16   : > { %v410_v14 = vld [vmem:[%s4284_s30 + $0xe0] sm:$0xff]   ;;  %403 = vst [vmem:[%s4292_s12 + $0x60] sm:$0xff] %v402_v12   ;;  %407 = vst [vmem:[%s4292_s12 + $0x68] sm:$0xff] %v406_v13   ;;  %v414_v15 = vld [vmem:[%s4284_s30 + $0xf0] sm:$0xff]  }
  0x17   : > { %411 = vst [vmem:[%s4292_s12 + $0x70] sm:$0xff] %v410_v14   ;;  %v418_v16 = vld [vmem:[%s4284_s30 + $0x100] sm:$0xff]   ;;  %v422_v17 = vld [vmem:[%s4284_s30 + $0x110] sm:$0xff]   ;;  %415 = vst [vmem:[%s4292_s12 + $0x78] sm:$0xff] %v414_v15  }
  0x18   : > { %419 = vst [vmem:[%s4292_s12 + $0x80] sm:$0xff] %v418_v16   ;;  %423 = vst [vmem:[%s4292_s12 + $0x88] sm:$0xff] %v422_v17   ;;  %v426_v18 = vld [vmem:[%s4284_s30 + $0x120] sm:$0xff]   ;;  %v430_v19 = vld [vmem:[%s4284_s30 + $0x130] sm:$0xff]  }
  0x19   : > { %v434_v20 = vld [vmem:[%s4284_s30 + $0x140] sm:$0xff]   ;;  %427 = vst [vmem:[%s4292_s12 + $0x90] sm:$0xff] %v426_v18   ;;  %431 = vst [vmem:[%s4292_s12 + $0x98] sm:$0xff] %v430_v19   ;;  %v438_v21 = vld [vmem:[%s4284_s30 + $0x150] sm:$0xff]  }
  0x1a   : > { %435 = vst [vmem:[%s4292_s12 + $0xa0] sm:$0xff] %v434_v20   ;;  %v442_v22 = vld [vmem:[%s4284_s30 + $0x160] sm:$0xff]   ;;  %v446_v23 = vld [vmem:[%s4284_s30 + $0x170] sm:$0xff]   ;;  %439 = vst [vmem:[%s4292_s12 + $0xa8] sm:$0xff] %v438_v21  }
  0x1b   : > { %443 = vst [vmem:[%s4292_s12 + $0xb0] sm:$0xff] %v442_v22   ;;  %447 = vst [vmem:[%s4292_s12 + $0xb8] sm:$0xff] %v446_v23   ;;  %v450_v24 = vld [vmem:[%s4284_s30 + $0x180] sm:$0xff]   ;;  %v454_v25 = vld [vmem:[%s4284_s30 + $0x190] sm:$0xff]  }
  0x1c   : > { %v458_v26 = vld [vmem:[%s4284_s30 + $0x1a0] sm:$0xff]   ;;  %451 = vst [vmem:[%s4292_s12 + $0xc0] sm:$0xff] %v450_v24   ;;  %455 = vst [vmem:[%s4292_s12 + $0xc8] sm:$0xff] %v454_v25   ;;  %v462_v27 = vld [vmem:[%s4284_s30 + $0x1b0] sm:$0xff]  }
  0x1d   : > { %459 = vst [vmem:[%s4292_s12 + $0xd0] sm:$0xff] %v458_v26   ;;  %463 = vst [vmem:[%s4292_s12 + $0xd8] sm:$0xff] %v462_v27  }
  0x1e PF: > { %p3566_p5 = scmp.ge.s32.totalorder %s4177_s19, 1  ;;  %p600_p6 = scmp.lt.s32.totalorder %s4177_s19, 3 }
  0x20   : > { %p601_p7 = pnand %p3566_p5, %p600_p6 }
  0x21   : > { %s607_s13 = sand.u32 (!%p601_p7), 1, %s4169_s17   ;;  %s4179_s12 = smov (!%p601_p7), 28  }
  0x22   : > { %604 = sbr.rel (%p601_p7) target bundleno = 1566 (0x61e), region = 101  ;;  %s4181_s14 = smov (!%p601_p7), 56  }
  0x23   : > { %s3973_s16 = smul.u32 (!%p601_p7), 224, %s607_s13  ;;  %s4180_s13 = smov (!%p601_p7), 84  }
  0x24   : > { %s4182_s15 = smov (!%p601_p7), 112   ;;  %s4184_s25 = smov (!%p601_p7), 32  }
  0x25   : > { %s4362_s30 = scalar_lea.vmem (!%p601_p7), [#allocation2], %s3973_s16 }
  0x27   : > { %v4023_v28 = vld [vmem:[%s5747_s1 + $0x74] ss:$8 sps:$4 sm:$0xff]   ;;  %v4025_v29 = vld [vmem:[%s5747_s1 + $0x70] ss:$8 sps:$4 sm:$0xff]   ;;  %v4026_v30 = vld [vmem:[%s5747_s1 + $0x64] ss:$8 sps:$4 sm:$0xff]  }
  0x28   : > { %1460 = vmatprep.subr.bf16.mxu0 %v4023_v28  ;;  %v4028_v31 = vld [vmem:[%s5747_s1 + $0x60] ss:$8 sps:$4 sm:$0xff]   ;;  %v4030_v32 = vld [vmem:[%s5747_s1 + $0x54] ss:$8 sps:$4 sm:$0xff]   ;;  %v4032_v38 = vld [vmem:[%s5747_s1 + $0x50] ss:$8 sps:$4 sm:$0xff]  }
  0x29   : > { %1461 = vmatpush1.bf16.msra.mxu0 %v4025_v29  ;;  %v4365_v33 = vld [vmem:[%s4362_s30 + $0x8] sm:$0xff]   ;;  %v4368_v34 = vld [vmem:[%s4362_s30 + $0x18] sm:$0xff]   ;;  %v4373_v35 = vld [vmem:[%s4362_s30 + $0x10] sm:$0xff]   ;;  %vm1453_vm0 = vcmask 1045504   ;;  %vm1042_vm1 = vcmask 228352   ;;  %vm1115_vm2 = vcmask 457728  }
  0x2a   : > { %1462 = vmatprep.subr.bf16.mxu0 %v4026_v30  ;;  %835 = vrot.lane.b32.xlu0 %v4365_v33, %s4179_s12  ;;  %v4378_v36 = vld [vmem:[%s4362_s30 + $0x20] sm:$0xff]   ;;  %v4389_v37 = vld [vmem:[%s4362_s30 + $0x28] sm:$0xff]   ;;  %v4037_v41 = vld [vmem:[%s5747_s1 + $0x34] ss:$8 sps:$4 sm:$0xff]   ;;  %vm1404_vm3 = vcmask 97280   ;;  %vm1164_vm4 = vcmask 687104  }
  0x2b   : > { %941 = vrot.lane.b32.xlu1 %v4368_v34, %s4180_s13  ;;  %v4033_v39 = vld [vmem:[%s5747_s1 + $0x44] ss:$8 sps:$4 sm:$0xff]   ;;  %v4035_v40 = vld [vmem:[%s5747_s1 + $0x40] ss:$8 sps:$4 sm:$0xff]   ;;  %v4412_v42 = vld [vmem:[%s4362_s30 + $0x30] sm:$0xff]   ;;  %vm1213_vm5 = vcmask 916480  }
  0x2c   : > { %v4039_v43 = vld [vmem:[%s5747_s1 + $0x30] ss:$8 sps:$4 sm:$0xff]   ;;  %v4040_v44 = vld [vmem:[%s5747_s1 + $0x24] ss:$8 sps:$4 sm:$0xff]   ;;  %v4042_v45 = vld [vmem:[%s5747_s1 + $0x20] ss:$8 sps:$4 sm:$0xff]  }
  0x2d   : > { %1463 = vmatpush1.bf16.msra.mxu0 %v4028_v31  ;;  %v4044_v46 = vld [vmem:[%s5747_s1 + $0x14] ss:$8 sps:$4 sm:$0xff]   ;;  %v4046_v48 = vld [vmem:[%s5747_s1 + $0x10] ss:$8 sps:$4 sm:$0xff]   ;;  %v4047_v49 = vld [vmem:[%s5747_s1 + $0x4] ss:$8 sps:$4 sm:$0xff]  }
  0x2e   : > { %1464 = vmatprep.subr.bf16.mxu0 %v4030_v32  ;;  %888 = vrot.lane.b32.xlu0 %v4373_v35, %s4181_s14  ;;  %v4435_v47 = vld [vmem:[%s4362_s30 + $0x38] sm:$0xff]   ;;  %v4050_v50 = vld [vmem:[%s5747_s1] ss:$8 sps:$4 sm:$0xff]   ;;  %v4052_v51 = vld [vmem:[%s5747_s1 + $0x84] ss:$8 sps:$4 sm:$0x3f]  }
  0x2f   : > { %994 = vrot.lane.b32.xlu1 %v4378_v36, %s4182_s15  ;;  %v4054_v52 = vld [vmem:[%s5747_s1 + $0x80] ss:$8 sps:$4 sm:$0x3f]   ;;  %v4481_v56 = vld [vmem:[%s4362_s30 + $0x50] sm:$0xff]   ;;  %v4492_v57 = vld [vmem:[%s4362_s30 + $0x58] sm:$0xff]   ;;  %vm1949_vm6 = vcmask 130048  }
  0x30   : > { %v4457_v53 = vld [vmem:[%s4362_s30 + $0x40] sm:$0xff]   ;;  %v1455_v54 = vsel %vm1453_vm0, %v4054_v52, 0  ;;  %v4470_v55 = vld [vmem:[%s4362_s30 + $0x48] sm:$0xff]   ;;  %v4525_v60 = vld [vmem:[%s4362_s30 + $0x70] sm:$0xff]   ;;  %vm2035_vm7 = vcmask 392192   ;;  %vm1992_vm8 = vcmask 261120  }
  0x31   : > { %1465 = vmatpush1.bf16.msra.mxu0 %v4032_v38  ;;  %v4503_v58 = vld [vmem:[%s4362_s30 + $0x60] sm:$0xff]   ;;  %v4514_v59 = vld [vmem:[%s4362_s30 + $0x68] sm:$0xff]   ;;  %v4536_v61 = vld [vmem:[%s4362_s30 + $0x78] sm:$0xff]   ;;  %vm2078_vm9 = vcmask 523264   ;;  %vm2586_vm10 = vcmask 654336   ;;  %vm3349_vm11 = vcmask 1043456  }
  0x32   : > { %837 = vrot.lane.b32.xlu0 %v4373_v35, %s4179_s12  ;;  %1466 = vmatprep.subr.bf16.mxu0 %v4033_v39  ;;  %v4551_v62 = vld [vmem:[%s4362_s30 + $0x80] sm:$0xff]   ;;  %v4562_v63 = vld [vmem:[%s4362_s30 + $0x88] sm:$0xff]   ;;  %v4573_v0 = vld [vmem:[%s4362_s30 + $0x90] sm:$0xff]   ;;  %vm4189_vm12 = vmmov 0   ;;  %vm3451_vm13 = vcmask 1041408   ;;  %vm3345_vm14 = vcmask 982016  }
  0x33   : > { %890 = vrot.lane.b32.xlu1 %v4368_v34, %s4181_s14  ;;  %v4049_v2 = vld [vmem:[%s4362_s30] sm:$0xff]   ;;  %v4590_v10 = vld [vmem:[%s4362_s30 + $0x98] sm:$0xff]   ;;  %v4624_v28 = vld [vmem:[%s4362_s30 + $0xa8] sm:$0xff]  }
  0x34   : > { %v4607_v19 = vld [vmem:[%s4362_s30 + $0xa0] sm:$0xff]  }
  0x35   : > { %1467 = vmatpush1.bf16.msra.mxu0 %v4035_v40 }
  0x36   : > { %943 = vrot.lane.b32.xlu0 %v4378_v36, %s4180_s13  ;;  %1468 = vmatprep.subr.bf16.mxu0 %v4037_v41 }
  0x37   : > { %996 = vrot.lane.b32.xlu1 %v4389_v37, %s4182_s15 }
  0x39   : > { %1469 = vmatpush1.bf16.msra.mxu0 %v4039_v43 }
  0x3a   : > { %839 = vrot.lane.b32.xlu0 %v4368_v34, %s4179_s12  ;;  %1470 = vmatprep.subr.bf16.mxu0 %v4040_v44 }
  0x3b   : > { %892 = vrot.lane.b32.xlu1 %v4378_v36, %s4181_s14 }
  0x3d   : > { %1471 = vmatpush1.bf16.msra.mxu0 %v4042_v45 }
  0x3e   : > { %945 = vrot.lane.b32.xlu0 %v4389_v37, %s4180_s13  ;;  %1472 = vmatprep.subr.bf16.mxu0 %v4044_v46 }
  0x3f   : > { %998 = vrot.lane.b32.xlu1 %v4412_v42, %s4182_s15 }
  0x41   : > { %1473 = vmatpush1.bf16.msra.mxu0 %v4046_v48 }
  0x42   : > { %841 = vrot.lane.b32.xlu0 %v4378_v36, %s4179_s12  ;;  %1474 = vmatprep.subr.bf16.mxu0 %v4047_v49 }
  0x43   : > { %894 = vrot.lane.b32.xlu1 %v4389_v37, %s4181_s14 }
  0x45   : > { %1475 = vmatpush1.bf16.msra.mxu0 %v4050_v50 }
  0x46   : > { %947 = vrot.lane.b32.xlu0 %v4412_v42, %s4180_s13  ;;  %3615 = vmatprep.subr.msk.bf16.mxu0 %vm1453_vm0, %v4052_v51 }
  0x47   : > { %1000 = vrot.lane.b32.xlu1 %v4435_v47, %s4182_s15 }
  0x49   : > { %1491 = vmatpush2.bf16.msra.mxu0 %v1455_v54 }
  0x4a   : > { %843 = vrot.lane.b32.xlu0 %v4389_v37, %s4179_s12 }
  0x4b   : > { %896 = vrot.lane.b32.xlu1 %v4412_v42, %s4181_s14 }
  0x4e   : > { %949 = vrot.lane.b32.xlu0 %v4435_v47, %s4180_s13 }
  0x4f   : > { %1002 = vrot.lane.b32.xlu1 %v4457_v53, %s4182_s15 }
  0x52   : > { %845 = vrot.lane.b32.xlu0 %v4412_v42, %s4179_s12 }
  0x53   : > { %898 = vrot.lane.b32.xlu1 %v4435_v47, %s4181_s14 }
  0x56   : > { %951 = vrot.lane.b32.xlu0 %v4457_v53, %s4180_s13 }
  0x57   : > { %1004 = vrot.lane.b32.xlu1 %v4470_v55, %s4182_s15 }
  0x5a   : > { %847 = vrot.lane.b32.xlu0 %v4435_v47, %s4179_s12 }
  0x5b   : > { %900 = vrot.lane.b32.xlu1 %v4457_v53, %s4181_s14 }
  0x5e   : > { %953 = vrot.lane.b32.xlu0 %v4470_v55, %s4180_s13 }
  0x5f   : > { %1006 = vrot.lane.b32.xlu1 %v4481_v56, %s4182_s15 }
  0x62   : > { %849 = vrot.lane.b32.xlu0 %v4457_v53, %s4179_s12 }
  0x63   : > { %902 = vrot.lane.b32.xlu1 %v4470_v55, %s4181_s14 }
  0x66   : > { %955 = vrot.lane.b32.xlu0 %v4481_v56, %s4180_s13 }
  0x67   : > { %1008 = vrot.lane.b32.xlu1 %v4492_v57, %s4182_s15 }
  0x6a   : > { %851 = vrot.lane.b32.xlu0 %v4470_v55, %s4179_s12 }
  0x6b   : > { %904 = vrot.lane.b32.xlu1 %v4481_v56, %s4181_s14 }
  0x6e   : > { %957 = vrot.lane.b32.xlu0 %v4492_v57, %s4180_s13 }
  0x6f   : > { %1010 = vrot.lane.b32.xlu1 %v4503_v58, %s4182_s15 }
  0x72   : > { %853 = vrot.lane.b32.xlu0 %v4481_v56, %s4179_s12 }
  0x73   : > { %906 = vrot.lane.b32.xlu1 %v4492_v57, %s4181_s14 }
  0x76   : > { %959 = vrot.lane.b32.xlu0 %v4503_v58, %s4180_s13 }
  0x77   : > { %1012 = vrot.lane.b32.xlu1 %v4514_v59, %s4182_s15 }
  0x7a   : > { %855 = vrot.lane.b32.xlu0 %v4492_v57, %s4179_s12 }
  0x7b   : > { %908 = vrot.lane.b32.xlu1 %v4503_v58, %s4181_s14 }
  0x7e   : > { %961 = vrot.lane.b32.xlu0 %v4514_v59, %s4180_s13 }
  0x7f   : > { %1014 = vrot.lane.b32.xlu1 %v4525_v60, %s4182_s15 }
  0x82   : > { %857 = vrot.lane.b32.xlu0 %v4503_v58, %s4179_s12 }
  0x83   : > { %910 = vrot.lane.b32.xlu1 %v4514_v59, %s4181_s14 }
  0x86   : > { %963 = vrot.lane.b32.xlu0 %v4525_v60, %s4180_s13 }
  0x87   : > { %1016 = vrot.lane.b32.xlu1 %v4536_v61, %s4182_s15 }
  0x8a   : > { %859 = vrot.lane.b32.xlu0 %v4514_v59, %s4179_s12 }
  0x8b   : > { %912 = vrot.lane.b32.xlu1 %v4525_v60, %s4181_s14 }
  0x8e   : > { %965 = vrot.lane.b32.xlu0 %v4536_v61, %s4180_s13 }
  0x8f   : > { %1018 = vrot.lane.b32.xlu1 %v4551_v62, %s4182_s15 }
  0x92   : > { %861 = vrot.lane.b32.xlu0 %v4525_v60, %s4179_s12 }
  0x93   : > { %914 = vrot.lane.b32.xlu1 %v4536_v61, %s4181_s14 }
  0x96   : > { %967 = vrot.lane.b32.xlu0 %v4551_v62, %s4180_s13 }
  0x97   : > { %1020 = vrot.lane.b32.xlu1 %v4562_v63, %s4182_s15 }
  0x9a   : > { %863 = vrot.lane.b32.xlu0 %v4536_v61, %s4179_s12 }
  0x9b   : > { %916 = vrot.lane.b32.xlu1 %v4551_v62, %s4181_s14 }
  0x9c   : > { %v836_v1 = vpop.permute.xlu0 %835 }
  0x9d   : > { %v942_v3 = vpop.permute.xlu1 %941  ;;  %v1045_v4 = vsel %vm1042_vm1, %v4049_v2, %v836_v1 }
  0x9e   : > { %969 = vrot.lane.b32.xlu0 %v4562_v63, %s4180_s13 }
  0x9f   : > { %1022 = vrot.lane.b32.xlu1 %v4573_v0, %s4182_s15 }
  0xa0   : > { %v889_v5 = vpop.permute.xlu0 %888 }
  0xa1   : > { %v1117_v6 = vsel %vm1115_vm2, %v1045_v4, %v889_v5  ;;  %v995_v7 = vpop.permute.xlu1 %994 }
  0xa2   : > { %865 = vrot.lane.b32.xlu0 %v4551_v62, %s4179_s12  ;;  %3616 = vmatprep.mubr.msk.bf16.mxu0 %vm1404_vm3, %v995_v7  ;;  %v1166_v8 = vsel %vm1164_vm4, %v1117_v6, %v942_v3 }
  0xa3   : > { %918 = vrot.lane.b32.xlu1 %v4562_v63, %s4181_s14  ;;  %v1215_v9 = vsel %vm1213_vm5, %v1166_v8, %v995_v7 }
  0xa4   : > { %v838_v11 = vpop.permute.xlu0 %837  ;;  %1493 = vmatmul.mubr.bf16.vlgmr.msra.gmra.mxu0 %v1215_v9 }
  0xa5   : > { %v1048_v12 = vsel %vm1042_vm1, %v4365_v33, %v838_v11  ;;  %v891_v13 = vpop.permute.xlu1 %890 }
  0xa6   : > { %v1119_v14 = vsel %vm1115_vm2, %v1048_v12, %v891_v13  ;;  %971 = vrot.lane.b32.xlu0 %v4573_v0, %s4180_s13 }
  0xa7   : > { %1024 = vrot.lane.b32.xlu1 %v4590_v10, %s4182_s15 }
  0xa8   : > { %v944_v15 = vpop.permute.xlu0 %943 }
  0xa9   : > { %v1168_v16 = vsel %vm1164_vm4, %v1119_v14, %v944_v15  ;;  %v997_v17 = vpop.permute.xlu1 %996 }
  0xaa   : > { %867 = vrot.lane.b32.xlu0 %v4562_v63, %s4179_s12  ;;  %3617 = vmatprep.mubr.msk.bf16.mxu0 %vm1404_vm3, %v997_v17  ;;  %v1218_v18 = vsel %vm1213_vm5, %v1168_v16, %v997_v17 }
  0xab   : > { %920 = vrot.lane.b32.xlu1 %v4573_v0, %s4181_s14 }
  0xac   : > { %v840_v20 = vpop.permute.xlu0 %839  ;;  %1503 = vmatmul.mubr.bf16.gmra.mxu0 %v1218_v18 }
  0xad   : > { %v1051_v21 = vsel %vm1042_vm1, %v4373_v35, %v840_v20  ;;  %v893_v22 = vpop.permute.xlu1 %892 }
  0xae   : > { %v1121_v23 = vsel %vm1115_vm2, %v1051_v21, %v893_v22  ;;  %973 = vrot.lane.b32.xlu0 %v4590_v10, %s4180_s13 }
  0xaf   : > { %1026 = vrot.lane.b32.xlu1 %v4607_v19, %s4182_s15 }
  0xb0   : > { %v946_v24 = vpop.permute.xlu0 %945 }
  0xb1   : > { %v1170_v25 = vsel %vm1164_vm4, %v1121_v23, %v946_v24  ;;  %v999_v26 = vpop.permute.xlu1 %998 }
  0xb2   : > { %869 = vrot.lane.b32.xlu0 %v4573_v0, %s4179_s12  ;;  %3618 = vmatprep.mubr.msk.bf16.mxu0 %vm1404_vm3, %v999_v26  ;;  %v1221_v27 = vsel %vm1213_vm5, %v1170_v25, %v999_v26  ;;  %v1306_v26 = vlaneseq }
  0xb3   : > { %922 = vrot.lane.b32.xlu1 %v4590_v10, %s4181_s14 }
  0xb4   : > { %v842_v29 = vpop.permute.xlu0 %841  ;;  %1513 = vmatmul.mubr.bf16.gmra.mxu0 %v1221_v27 }
  0xb5   : > { %v1054_v30 = vsel %vm1042_vm1, %v4368_v34, %v842_v29  ;;  %v895_v31 = vpop.permute.xlu1 %894  ;;  %v4641_v34 = vld [vmem:[%s4362_s30 + $0xb0] sm:$0xff]  }
  0xb6   : > { %v1123_v32 = vsel %vm1115_vm2, %v1054_v30, %v895_v31  ;;  %975 = vrot.lane.b32.xlu0 %v4607_v19, %s4180_s13 }
  0xb7   : > { %1028 = vrot.lane.b32.xlu1 %v4624_v28, %s4182_s15 }
  0xb8   : > { %v948_v33 = vpop.permute.xlu0 %947 }
  0xb9   : > { %v1172_v35 = vsel %vm1164_vm4, %v1123_v32, %v948_v33  ;;  %v1001_v38 = vpop.permute.xlu1 %1000  ;;  %v4707_v32 = vshrl.u32 %v1306_v26, 7 }
  0xba   : > { %3619 = vmatprep.mubr.msk.bf16.mxu0 %vm1404_vm3, %v1001_v38  ;;  %v1224_v39 = vsel %vm1213_vm5, %v1172_v35, %v1001_v38  ;;  %871 = vrot.lane.b32.xlu0 %v4590_v10, %s4179_s12 }
  0xbb   : > { %924 = vrot.lane.b32.xlu1 %v4607_v19, %s4181_s14  ;;  %v1312_v35 = vsub.s32 1, %v4707_v32 }
  0xbc   : > { %v844_v40 = vpop.permute.xlu0 %843  ;;  %1523 = vmatmul.mubr.bf16.gmra.mxu0 %v1224_v39  ;;  %v4718_v39 = vld [vmem:[%s5748_s2] sm:$0x3] }
  0xbd   : > { %v1057_v41 = vsel %vm1042_vm1, %v4378_v36, %v844_v40  ;;  %v897_v43 = vpop.permute.xlu1 %896  ;;  %v4658_v36 = vld [vmem:[%s4362_s30 + $0xb8] sm:$0xff]  }
  0xbe   : > { %v1125_v44 = vsel %vm1115_vm2, %v1057_v41, %v897_v43  ;;  %977 = vrot.lane.b32.xlu0 %v4624_v28, %s4180_s13  ;;  %v4723_v43 = vrot.slane %v4718_v39, %v1312_v35 }
  0xbf   : > { %1030 = vrot.lane.b32.xlu1 %v4641_v34, %s4182_s15 }
  0xc0   : > { %v950_v45 = vpop.permute.xlu0 %949 }
  0xc1   : > { %v1174_v46 = vsel %vm1164_vm4, %v1125_v44, %v950_v45  ;;  %v1003_v48 = vpop.permute.xlu1 %1002 }
  0xc2   : > { %3620 = vmatprep.mubr.msk.bf16.mxu0 %vm1404_vm3, %v1003_v48  ;;  %v1227_v49 = vsel %vm1213_vm5, %v1174_v46, %v1003_v48  ;;  %873 = vrot.lane.b32.xlu0 %v4607_v19, %s4179_s12 }
  0xc3   : > { %926 = vrot.lane.b32.xlu1 %v4624_v28, %s4181_s14 }
  0xc4   : > { %v846_v50 = vpop.permute.xlu0 %845  ;;  %1533 = vmatmul.mubr.bf16.gmra.mxu0 %v1227_v49 }
  0xc5   : > { %v1060_v51 = vsel %vm1042_vm1, %v4389_v37, %v846_v50  ;;  %v899_v52 = vpop.permute.xlu1 %898  ;;  %v4060_v37 = vld [vmem:[%s4362_s30 + $0xc0] sm:$0xff]  }
  0xc6   : > { %v1127_v54 = vsel %vm1115_vm2, %v1060_v51, %v899_v52  ;;  %979 = vrot.lane.b32.xlu0 %v4641_v34, %s4180_s13 }
  0xc7   : > { %1032 = vrot.lane.b32.xlu1 %v4658_v36, %s4182_s15 }
  0xc8   : > { %v952_v1 = vpop.permute.xlu0 %951 }
  0xc9   : > { %v1176_v2 = vsel %vm1164_vm4, %v1127_v54, %v952_v1  ;;  %v1005_v3 = vpop.permute.xlu1 %1004 }
  0xca   : > { %3621 = vmatprep.mubr.msk.bf16.mxu0 %vm1404_vm3, %v1005_v3  ;;  %v1230_v4 = vsel %vm1213_vm5, %v1176_v2, %v1005_v3  ;;  %875 = vrot.lane.b32.xlu0 %v4624_v28, %s4179_s12 }
  0xcb   : > { %928 = vrot.lane.b32.xlu1 %v4641_v34, %s4181_s14 }
  0xcc   : > { %v848_v5 = vpop.permute.xlu0 %847  ;;  %1543 = vmatmul.mubr.bf16.gmra.mxu0 %v1230_v4 }
  0xcd   : > { %v1063_v6 = vsel %vm1042_vm1, %v4412_v42, %v848_v5  ;;  %v901_v7 = vpop.permute.xlu1 %900  ;;  %v4061_v42 = vld [vmem:[%s4362_s30 + $0xc8] sm:$0xff]  }
  0xce   : > { %v1129_v8 = vsel %vm1115_vm2, %v1063_v6, %v901_v7  ;;  %981 = vrot.lane.b32.xlu0 %v4658_v36, %s4180_s13 }
  0xcf   : > { %1034 = vrot.lane.b32.xlu1 %v4060_v37, %s4182_s15 }
  0xd0   : > { %v954_v9 = vpop.permute.xlu0 %953 }
  0xd1   : > { %v1178_v11 = vsel %vm1164_vm4, %v1129_v8, %v954_v9  ;;  %v1007_v12 = vpop.permute.xlu1 %1006 }
  0xd2   : > { %3622 = vmatprep.mubr.msk.bf16.mxu0 %vm1404_vm3, %v1007_v12  ;;  %v1233_v13 = vsel %vm1213_vm5, %v1178_v11, %v1007_v12  ;;  %877 = vrot.lane.b32.xlu0 %v4641_v34, %s4179_s12 }
  0xd3   : > { %930 = vrot.lane.b32.xlu1 %v4658_v36, %s4181_s14 }
  0xd4   : > { %v850_v14 = vpop.permute.xlu0 %849  ;;  %1553 = vmatmul.mubr.bf16.gmra.mxu0 %v1233_v13 }
  0xd5   : > { %v1066_v15 = vsel %vm1042_vm1, %v4435_v47, %v850_v14  ;;  %v903_v16 = vpop.permute.xlu1 %902  ;;  %v4062_v47 = vld [vmem:[%s4362_s30 + $0xd0] sm:$0xff]  }
  0xd6   : > { %v1131_v17 = vsel %vm1115_vm2, %v1066_v15, %v903_v16  ;;  %983 = vrot.lane.b32.xlu0 %v4060_v37, %s4180_s13 }
  0xd7   : > { %1036 = vrot.lane.b32.xlu1 %v4061_v42, %s4182_s15 }
  0xd8   : > { %v956_v18 = vpop.permute.xlu0 %955 }
  0xd9   : > { %v1180_v20 = vsel %vm1164_vm4, %v1131_v17, %v956_v18  ;;  %v1009_v21 = vpop.permute.xlu1 %1008 }
  0xda   : > { %3623 = vmatprep.mubr.msk.bf16.mxu0 %vm1404_vm3, %v1009_v21  ;;  %v1236_v22 = vsel %vm1213_vm5, %v1180_v20, %v1009_v21  ;;  %879 = vrot.lane.b32.xlu0 %v4658_v36, %s4179_s12 }
  0xdb   : > { %932 = vrot.lane.b32.xlu1 %v4060_v37, %s4181_s14 }
  0xdc   : > { %v852_v23 = vpop.permute.xlu0 %851  ;;  %1563 = vmatmul.mubr.bf16.gmra.mxu0 %v1236_v22 }
  0xdd   : > { %v1069_v24 = vsel %vm1042_vm1, %v4457_v53, %v852_v23  ;;  %v905_v25 = vpop.permute.xlu1 %904  ;;  %v4063_v53 = vld [vmem:[%s4362_s30 + $0xd8] sm:$0xff]   ;;  %s4185_s30 = smov 48  }
  0xde   : > { %v1133_v27 = vsel %vm1115_vm2, %v1069_v24, %v905_v25  ;;  %985 = vrot.lane.b32.xlu0 %v4061_v42, %s4180_s13 }
  0xdf   : > { %1038 = vrot.lane.b32.xlu1 %v4062_v47, %s4182_s15 }
  0xe0   : > { %v958_v29 = vpop.permute.xlu0 %957 }
  0xe1   : > { %v1182_v30 = vsel %vm1164_vm4, %v1133_v27, %v958_v29  ;;  %v1011_v31 = vpop.permute.xlu1 %1010 }
  0xe2   : > { %3624 = vmatprep.mubr.msk.bf16.mxu0 %vm1404_vm3, %v1011_v31  ;;  %v1239_v33 = vsel %vm1213_vm5, %v1182_v30, %v1011_v31  ;;  %881 = vrot.lane.b32.xlu0 %v4060_v37, %s4179_s12 }
  0xe3   : > { %934 = vrot.lane.b32.xlu1 %v4061_v42, %s4181_s14 }
  0xe4   : > { %v854_v38 = vpop.permute.xlu0 %853  ;;  %1573 = vmatmul.mubr.bf16.gmra.mxu0 %v1239_v33 }
  0xe5   : > { %v1072_v40 = vsel %vm1042_vm1, %v4470_v55, %v854_v38  ;;  %v907_v41 = vpop.permute.xlu1 %906 }
  0xe6   : > { %v1135_v44 = vsel %vm1115_vm2, %v1072_v40, %v907_v41  ;;  %987 = vrot.lane.b32.xlu0 %v4062_v47, %s4180_s13  ;;  %s3567_s13 = sshll.u32 %s3560_s20, 1 }
  0xe7   : > { %1040 = vrot.lane.b32.xlu1 %v4063_v53, %s4182_s15  ;;  %s4183_s15 = smov 16   ;;  %p648_p8 = scmp.lt.s32.totalorder %s3567_s13, 3 }
  0xe8   : > { %v960_v45 = vpop.permute.xlu0 %959 }
  0xe9   : > { %v1184_v46 = vsel %vm1164_vm4, %v1135_v44, %v960_v45  ;;  %v1013_v48 = vpop.permute.xlu1 %1012  ;;  %s5762_s13 = smov (!%p648_p8, %s3567_s13), 3 }
  0xea   : > { %3625 = vmatprep.mubr.msk.bf16.mxu0 %vm1404_vm3, %v1013_v48  ;;  %v1242_v49 = vsel %vm1213_vm5, %v1184_v46, %v1013_v48 }
  0xec   : > { %v856_v50 = vpop.permute.xlu0 %855  ;;  %1583 = vmatmul.mubr.bf16.gmra.mxu0 %v1242_v49 }
  0xed   : > { %v1075_v55 = vsel %vm1042_vm1, %v4481_v56, %v856_v50  ;;  %v909_v51 = vpop.permute.xlu1 %908 }
  0xee   : > { %v1137_v52 = vsel %vm1115_vm2, %v1075_v55, %v909_v51 }
  0xf0   : > { %v962_v54 = vpop.permute.xlu0 %961 }
  0xf1   : > { %v1186_v1 = vsel %vm1164_vm4, %v1137_v52, %v962_v54  ;;  %v1015_v2 = vpop.permute.xlu1 %1014 }
  0xf2   : > { %3626 = vmatprep.mubr.msk.bf16.mxu0 %vm1404_vm3, %v1015_v2  ;;  %v1245_v3 = vsel %vm1213_vm5, %v1186_v1, %v1015_v2 }
  0xf4   : > { %v858_v4 = vpop.permute.xlu0 %857  ;;  %1593 = vmatmul.mubr.bf16.gmra.mxu0 %v1245_v3 }
  0xf5   : > { %v1078_v37 = vsel %vm1042_vm1, %v4492_v57, %v858_v4  ;;  %v911_v5 = vpop.permute.xlu1 %910 }
  0xf6   : > { %v1139_v6 = vsel %vm1115_vm2, %v1078_v37, %v911_v5 }
  0xf8   : > { %v964_v56 = vpop.permute.xlu0 %963 }
  0xf9   : > { %v1188_v7 = vsel %vm1164_vm4, %v1139_v6, %v964_v56  ;;  %v1017_v8 = vpop.permute.xlu1 %1016 }
  0xfa   : > { %3627 = vmatprep.mubr.msk.bf16.mxu0 %vm1404_vm3, %v1017_v8  ;;  %v1248_v9 = vsel %vm1213_vm5, %v1188_v7, %v1017_v8 }
  0xfc   : > { %v860_v11 = vpop.permute.xlu0 %859  ;;  %1603 = vmatmul.mubr.bf16.gmra.mxu0 %v1248_v9 }
  0xfd   : > { %v1081_v12 = vsel %vm1042_vm1, %v4503_v58, %v860_v11  ;;  %v913_v13 = vpop.permute.xlu1 %912 }
  0xfe   : > { %v1141_v42 = vsel %vm1115_vm2, %v1081_v12, %v913_v13 }
 0x100   : > { %v966_v57 = vpop.permute.xlu0 %965 }
 0x101   : > { %v1190_v14 = vsel %vm1164_vm4, %v1141_v42, %v966_v57  ;;  %v1019_v15 = vpop.permute.xlu1 %1018 }
 0x102   : > { %3628 = vmatprep.mubr.msk.bf16.mxu0 %vm1404_vm3, %v1019_v15  ;;  %v1251_v16 = vsel %vm1213_vm5, %v1190_v14, %v1019_v15 }
 0x104   : > { %v862_v17 = vpop.permute.xlu0 %861  ;;  %1613 = vmatmul.mubr.bf16.gmra.mxu0 %v1251_v16 }
 0x105   : > { %v1084_v18 = vsel %vm1042_vm1, %v4514_v59, %v862_v17  ;;  %v915_v20 = vpop.permute.xlu1 %914 }
 0x106   : > { %v1143_v21 = vsel %vm1115_vm2, %v1084_v18, %v915_v20 }
 0x108   : > { %v968_v58 = vpop.permute.xlu0 %967 }
 0x109   : > { %v1192_v22 = vsel %vm1164_vm4, %v1143_v21, %v968_v58  ;;  %v1021_v47 = vpop.permute.xlu1 %1020 }
 0x10a   : > { %3629 = vmatprep.mubr.msk.bf16.mxu0 %vm1404_vm3, %v1021_v47  ;;  %v1254_v23 = vsel %vm1213_vm5, %v1192_v22, %v1021_v47 }
 0x10c   : > { %v864_v24 = vpop.permute.xlu0 %863  ;;  %1623 = vmatmul.mubr.bf16.gmra.mxu0 %v1254_v23 }
 0x10d   : > { %v1087_v25 = vsel %vm1042_vm1, %v4525_v60, %v864_v24  ;;  %v917_v26 = vpop.permute.xlu1 %916 }
 0x10e   : > { %v1145_v27 = vsel %vm1115_vm2, %v1087_v25, %v917_v26 }
 0x110   : > { %v970_v59 = vpop.permute.xlu0 %969 }
 0x111   : > { %v1194_v29 = vsel %vm1164_vm4, %v1145_v27, %v970_v59  ;;  %v1023_v30 = vpop.permute.xlu1 %1022 }
 0x112   : > { %3630 = vmatprep.mubr.msk.bf16.mxu0 %vm1404_vm3, %v1023_v30  ;;  %v1257_v31 = vsel %vm1213_vm5, %v1194_v29, %v1023_v30 }
 0x114   : > { %v866_v33 = vpop.permute.xlu0 %865  ;;  %1633 = vmatmul.mubr.bf16.gmra.mxu0 %v1257_v31 }
 0x115   : > { %v1090_v53 = vsel %vm1042_vm1, %v4536_v61, %v866_v33  ;;  %v919_v35 = vpop.permute.xlu1 %918 }
 0x116   : > { %v1147_v38 = vsel %vm1115_vm2, %v1090_v53, %v919_v35 }
 0x118   : > { %v972_v60 = vpop.permute.xlu0 %971 }
 0x119   : > { %v1196_v40 = vsel %vm1164_vm4, %v1147_v38, %v972_v60  ;;  %v1025_v41 = vpop.permute.xlu1 %1024 }
 0x11a   : > { %3631 = vmatprep.mubr.msk.bf16.mxu0 %vm1404_vm3, %v1025_v41  ;;  %v1260_v44 = vsel %vm1213_vm5, %v1196_v40, %v1025_v41 }
 0x11c   : > { %v868_v45 = vpop.permute.xlu0 %867  ;;  %1643 = vmatmul.mubr.bf16.gmra.mxu0 %v1260_v44 }
 0x11d   : > { %v1093_v46 = vsel %vm1042_vm1, %v4551_v62, %v868_v45  ;;  %v921_v48 = vpop.permute.xlu1 %920 }
 0x11e   : > { %v1149_v49 = vsel %vm1115_vm2, %v1093_v46, %v921_v48 }
 0x120   : > { %v974_v61 = vpop.permute.xlu0 %973 }
 0x121   : > { %v1198_v50 = vsel %vm1164_vm4, %v1149_v49, %v974_v61  ;;  %v1027_v55 = vpop.permute.xlu1 %1026  ;;  %v4064_v61 = vld [vmem:[%s5749_s3 + $0x78] sm:$0xff]  }
 0x122   : > { %3632 = vmatprep.mubr.msk.bf16.mxu0 %vm1404_vm3, %v1027_v55  ;;  %v1263_v51 = vsel %vm1213_vm5, %v1198_v50, %v1027_v55  ;;  %3748 = vmatprep.subr.bf16.mxu1 %v4064_v61  ;;  %v4066_v50 = vld [vmem:[%s5749_s3 + $0x70] sm:$0xff]  }
 0x123   : > { %v4067_v55 = vld [vmem:[%s5749_s3 + $0x30] sm:$0xff]  }
 0x124   : > { %v870_v52 = vpop.permute.xlu0 %869  ;;  %1653 = vmatmul.mubr.bf16.gmra.mxu0 %v1263_v51  ;;  %v1308_v51 = vsub.s32 0, %v4707_v32  ;;  %v4070_v32 = vld [vmem:[%s5749_s3 + $0x60] sm:$0xff]  }
 0x125   : > { %v1096_v54 = vsel %vm1042_vm1, %v4562_v63, %v870_v52  ;;  %v923_v1 = vpop.permute.xlu1 %922 }
 0x126   : > { %v1151_v2 = vsel %vm1115_vm2, %v1096_v54, %v923_v1  ;;  %v4068_v54 = vld [vmem:[%s5749_s3 + $0x68] sm:$0xff]  }
 0x127   : > { %v4069_v1 = vld [vmem:[%s5749_s3 + $0x28] sm:$0xff]  }
 0x128   : > { %v976_v62 = vpop.permute.xlu0 %975 }
 0x129   : > { %v1200_v3 = vsel %vm1164_vm4, %v1151_v2, %v976_v62  ;;  %v1029_v4 = vpop.permute.xlu1 %1028  ;;  %v4835_v62 = vrot.slane %v4718_v39, %v1308_v51  ;;  %v4072_v39 = vld [vmem:[%s5749_s3 + $0x58] sm:$0xff]  }
 0x12a   : > { %3633 = vmatprep.mubr.msk.bf16.mxu0 %vm1404_vm3, %v1029_v4  ;;  %v1266_v37 = vsel %vm1213_vm5, %v1200_v3, %v1029_v4  ;;  %v4071_v4 = vld [vmem:[%s5749_s3 + $0x20] sm:$0xff]  }
 0x12c   : > { %1663 = vmatmul.mubr.bf16.gmra.mxu0 %v1266_v37  ;;  %v872_v5 = vpop.permute.xlu0 %871 }
 0x12d   : > { %v1099_v6 = vsel %vm1042_vm1, %v4573_v0, %v872_v5  ;;  %v925_v56 = vpop.permute.xlu1 %924 }
 0x12e   : > { %v1153_v7 = vsel %vm1115_vm2, %v1099_v6, %v925_v56 }
 0x130   : > { %v978_v63 = vpop.permute.xlu0 %977 }
 0x131   : > { %v1202_v8 = vsel %vm1164_vm4, %v1153_v7, %v978_v63  ;;  %v1031_v9 = vpop.permute.xlu1 %1030  ;;  %v4073_v63 = vld [vmem:[%s5749_s3 + $0x18] sm:$0xff]  }
 0x132   : > { %3634 = vmatprep.mubr.msk.bf16.mxu0 %vm1404_vm3, %v1031_v9  ;;  %v1269_v11 = vsel %vm1213_vm5, %v1202_v8, %v1031_v9 }
 0x134   : > { %1673 = vmatmul.mubr.bf16.gmra.mxu0 %v1269_v11  ;;  %v874_v12 = vpop.permute.xlu0 %873 }
 0x135   : > { %v1102_v13 = vsel %vm1042_vm1, %v4590_v10, %v874_v12  ;;  %v927_v42 = vpop.permute.xlu1 %926 }
 0x136   : > { %v1155_v57 = vsel %vm1115_vm2, %v1102_v13, %v927_v42 }
 0x138   : > { %v980_v0 = vpop.permute.xlu0 %979 }
 0x139   : > { %v1204_v14 = vsel %vm1164_vm4, %v1155_v57, %v980_v0  ;;  %v1033_v15 = vpop.permute.xlu1 %1032  ;;  %v4074_v0 = vld [vmem:[%s5749_s3 + $0x50] sm:$0xff]  }
 0x13a   : > { %3635 = vmatprep.mubr.msk.bf16.mxu0 %vm1404_vm3, %v1033_v15  ;;  %v1272_v16 = vsel %vm1213_vm5, %v1204_v14, %v1033_v15 }
 0x13c   : > { %1683 = vmatmul.mubr.bf16.gmra.mxu0 %v1272_v16  ;;  %v876_v17 = vpop.permute.xlu0 %875 }
 0x13d   : > { %v1105_v18 = vsel %vm1042_vm1, %v4607_v19, %v876_v17  ;;  %v929_v20 = vpop.permute.xlu1 %928 }
 0x13e   : > { %v1157_v21 = vsel %vm1115_vm2, %v1105_v18, %v929_v20  ;;  %v4075_v18 = vld [vmem:[%s5749_s3 + $0x10] sm:$0xff]  }
 0x140   : > { %v982_v10 = vpop.permute.xlu0 %981 }
 0x141   : > { %v1206_v58 = vsel %vm1164_vm4, %v1157_v21, %v982_v10  ;;  %v1035_v22 = vpop.permute.xlu1 %1034 }
 0x142   : > { %3636 = vmatprep.mubr.msk.bf16.mxu0 %vm1404_vm3, %v1035_v22  ;;  %v1275_v47 = vsel %vm1213_vm5, %v1206_v58, %v1035_v22 }
 0x144   : > { %1693 = vmatmul.mubr.bf16.gmra.mxu0 %v1275_v47  ;;  %v878_v23 = vpop.permute.xlu0 %877 }
 0x145   : > { %v1108_v24 = vsel %vm1042_vm1, %v4624_v28, %v878_v23  ;;  %v931_v25 = vpop.permute.xlu1 %930  ;;  %v4076_v23 = vld [vmem:[%s5749_s3 + $0x48] sm:$0xff]  }
 0x146   : > { %v1159_v26 = vsel %vm1115_vm2, %v1108_v24, %v931_v25 }
 0x148   : > { %v984_v19 = vpop.permute.xlu0 %983 }
 0x149   : > { %v1208_v27 = vsel %vm1164_vm4, %v1159_v26, %v984_v19  ;;  %v1037_v59 = vpop.permute.xlu1 %1036  ;;  %v4077_v19 = vld [vmem:[%s5749_s3 + $0x8] sm:$0xff]  }
 0x14a   : > { %3637 = vmatprep.mubr.msk.bf16.mxu0 %vm1404_vm3, %v1037_v59  ;;  %v1278_v29 = vsel %vm1213_vm5, %v1208_v27, %v1037_v59 }
 0x14c   : > { %1703 = vmatmul.mubr.bf16.gmra.mxu0 %v1278_v29  ;;  %v880_v30 = vpop.permute.xlu0 %879 }
 0x14d   : > { %v1111_v31 = vsel %vm1042_vm1, %v4641_v34, %v880_v30  ;;  %v933_v33 = vpop.permute.xlu1 %932 }
 0x14e   : > { %v1161_v53 = vsel %vm1115_vm2, %v1111_v31, %v933_v33  ;;  %v4078_v31 = vld [vmem:[%s5749_s3 + $0x40] sm:$0xff]  }
 0x14f   : > { %v4079_v33 = vld [vmem:[%s5749_s3] sm:$0xff]  }
 0x150   : > { %v986_v28 = vpop.permute.xlu0 %985 }
 0x151   : > { %v1210_v35 = vsel %vm1164_vm4, %v1161_v53, %v986_v28  ;;  %v1039_v38 = vpop.permute.xlu1 %1038 }
 0x152   : > { %3638 = vmatprep.mubr.msk.bf16.mxu0 %vm1404_vm3, %v1039_v38  ;;  %v1281_v60 = vsel %vm1213_vm5, %v1210_v35, %v1039_v38 }
 0x154   : > { %1713 = vmatmul.mubr.bf16.gmra.mxu0 %v1281_v60  ;;  %v882_v40 = vpop.permute.xlu0 %881 }
 0x155   : > { %v1114_v41 = vsel %vm1042_vm1, %v4658_v36, %v882_v40  ;;  %v935_v44 = vpop.permute.xlu1 %934  ;;  %v4065_v36 = vld [vmem:[%s5749_s3 + $0x38] sm:$0xff]  }
 0x156   : > { %v1163_v45 = vsel %vm1115_vm2, %v1114_v41, %v935_v44  ;;  %3749 = vmatpush3.bf16.msra.mxu1 %v4065_v36 }
 0x157   : > { %3750 = vmatprep.subr.bf16.mxu1 %v4066_v50 }
 0x158   : > { %v988_v34 = vpop.permute.xlu0 %987 }
 0x159   : > { %v1212_v46 = vsel %vm1164_vm4, %v1163_v45, %v988_v34  ;;  %v1041_v48 = vpop.permute.xlu1 %1040 }
 0x15a   : > { %3639 = vmatprep.mubr.msk.bf16.mxu0 %vm1404_vm3, %v1041_v48  ;;  %v1284_v49 = vsel %vm1213_vm5, %v1212_v46, %v1041_v48  ;;  %3751 = vmatpush3.bf16.msra.mxu1 %v4067_v55 }
 0x15b   : > { %3752 = vmatprep.subr.bf16.mxu1 %v4068_v54 }
 0x15c   : > { %1723 = vmatmul.mubr.bf16.gmra.mxu0 %v1284_v49 }
 0x15e   : > { %3753 = vmatpush3.bf16.msra.mxu1 %v4069_v1 }
 0x15f   : > { %3754 = vmatprep.subr.bf16.mxu1 %v4070_v32 }
 0x162   : > { %3755 = vmatpush3.bf16.msra.mxu1 %v4071_v4 }
 0x163   : > { %3756 = vmatprep.subr.bf16.mxu1 %v4072_v39 }
 0x164   : > { %v1494_v52 = vpop.f32.mrf.mxu0 }
 0x165   : > { %v1495_v5 = vadd.f32 %v1494_v52, %v4835_v62 }
 0x166   : > { %v1496_v2 = vpop.f32.mrf.mxu0  ;;  %3757 = vmatpush3.bf16.msra.mxu1 %v4073_v63 }
 0x167   : > { %v1497_v6 = vadd.f32 %v1496_v2, %v4723_v43  ;;  %v1733_v9 = vmax.f32 %v1495_v5, 0.0  ;;  %3758 = vmatprep.subr.bf16.mxu1 %v4074_v0 }
 0x168   : > { %v1498_v3 = vpop.f32.mrf.mxu0 }
 0x169   : > { %v1499_v11 = vadd.f32 %v1498_v3, %v4835_v62  ;;  %v1734_v42 = vmax.f32 %v1497_v6, 0.0 }
 0x16a   : > { %v1500_v37 = vpop.f32.mrf.mxu0  ;;  %3759 = vmatpush3.bf16.msra.mxu1 %v4075_v18 }
 0x16b   : > { %v1501_v14 = vadd.f32 %v1500_v37, %v4723_v43  ;;  %v1735_v21 = vmax.f32 %v1499_v11, 0.0  ;;  %3760 = vmatprep.subr.bf16.mxu1 %v4076_v23 }
 0x16c   : > { %v1504_v56 = vpop.f32.mrf.mxu0 }
 0x16d   : > { %v1505_v7 = vadd.f32 %v1504_v56, %v4835_v62  ;;  %v1736_v24 = vmax.f32 %v1501_v14, 0.0 }
 0x16e   : > { %v1506_v8 = vpop.f32.mrf.mxu0  ;;  %3761 = vmatpush3.bf16.msra.mxu1 %v4077_v19 }
 0x16f   : > { %v1737_v12 = vmax.f32 %v1505_v7, 0.0  ;;  %v1507_v13 = vadd.f32 %v1506_v8, %v4723_v43  ;;  %3762 = vmatprep.subr.bf16.mxu1 %v4078_v31 }
 0x170   : > { %v1508_v57 = vpop.f32.mrf.mxu0 }
 0x171   : > { %v4858_v15 = vadd.f32 %v1737_v12, %v1733_v9  ;;  %v1738_v16 = vmax.f32 %v1507_v13, 0.0  ;;  %v1509_v17 = vadd.f32 %v1508_v57, %v4835_v62 }
 0x172   : > { %v1510_v20 = vpop.f32.mrf.mxu0  ;;  %3763 = vmatpush3.bf16.msra.mxu1 %v4079_v33 }
 0x173   : > { %v4864_v10 = vadd.f32 %v1738_v16, %v1734_v42  ;;  %v1739_v58 = vmax.f32 %v1509_v17, 0.0  ;;  %v1511_v22 = vadd.f32 %v1510_v20, %v4723_v43 }
 0x174   : > { %v1514_v47 = vpop.f32.mrf.mxu0 }
 0x175   : > { %v4870_v25 = vadd.f32 %v1739_v58, %v1735_v21  ;;  %v1740_v26 = vmax.f32 %v1511_v22, 0.0  ;;  %v1515_v40 = vadd.f32 %v1514_v47, %v4835_v62 }
 0x176   : > { %v1516_v27 = vpop.f32.mrf.mxu0 }
 0x177   : > { %v4875_v59 = vadd.f32 %v1740_v26, %v1736_v24  ;;  %v1877_v29 = vpack.c.bf16 %v4870_v25, %v4858_v15  ;;  %v1517_v35 = vadd.f32 %v1516_v27, %v4723_v43  ;;  %v1741_v50 = vmax.f32 %v1515_v40, 0.0  ;;  %v4085_v25 = vld [vmem:[%s5749_s3 + $0xa8] sm:$0xff]  }
 0x178   : > { %v1518_v30 = vpop.f32.mrf.mxu0 }
 0x179   : > { %v1878_v53 = vpack.c.bf16 %v4875_v59, %v4864_v10  ;;  %v1519_v44 = vadd.f32 %v1518_v30, %v4835_v62  ;;  %v1742_v34 = vmax.f32 %v1517_v35, 0.0  ;;  %v4083_v59 = vld [vmem:[%s5749_s3 + $0xb0] sm:$0xff]  }
 0x17a   : > { %v1520_v28 = vpop.f32.mrf.mxu0 }
 0x17b   : > { %v1521_v48 = vadd.f32 %v1520_v28, %v4723_v43  ;;  %v1743_v51 = vmax.f32 %v1519_v44, 0.0 }
 0x17c   : > { %v1524_v38 = vpop.f32.mrf.mxu0 }
 0x17d   : > { %v1525_v60 = vadd.f32 %v1524_v38, %v4835_v62  ;;  %v1744_v3 = vmax.f32 %v1521_v48, 0.0 }
 0x17e   : > { %v1526_v41 = vpop.f32.mrf.mxu0 }
 0x17f   : > { %v1527_v45 = vadd.f32 %v1526_v41, %v4723_v43  ;;  %v1745_v49 = vmax.f32 %v1525_v60, 0.0 }
 0x180   : > { %v1528_v46 = vpop.f32.mrf.mxu0 }
 0x181   : > { %v1746_v61 = vmax.f32 %v1527_v45, 0.0  ;;  %v1529_v36 = vadd.f32 %v1528_v46, %v4835_v62  ;;  %v1833_v32 = vadd.f32 %v1745_v49, %v1741_v50 }
 0x182   : > { %v1530_v55 = vpop.f32.mrf.mxu0 }
 0x183   : > { %v1834_v52 = vadd.f32 %v1746_v61, %v1742_v34  ;;  %v1747_v54 = vmax.f32 %v1529_v36, 0.0  ;;  %v1531_v1 = vadd.f32 %v1530_v55, %v4723_v43 }
 0x184   : > { %v1534_v2 = vpop.f32.mrf.mxu0 }
 0x185   : > { %v1835_v4 = vadd.f32 %v1747_v54, %v1743_v51  ;;  %v1748_v37 = vmax.f32 %v1531_v1, 0.0  ;;  %v1535_v12 = vadd.f32 %v1534_v2, %v4835_v62 }
 0x186   : > { %v1536_v5 = vpop.f32.mrf.mxu0 }
 0x187   : > { %v1836_v6 = vadd.f32 %v1748_v37, %v1744_v3  ;;  %v4895_v56 = vpack.c.bf16 %v1835_v4, %v1833_v32  ;;  %v1537_v8 = vadd.f32 %v1536_v5, %v4723_v43  ;;  %v1749_v21 = vmax.f32 %v1535_v12, 0.0 }
 0x188   : > { %v1538_v39 = vpop.f32.mrf.mxu0 }
 0x189   : > { %v4897_v7 = vpack.c.bf16 %v1836_v6, %v1834_v52  ;;  %1917 = vrot.lane.b32.xlu0 %v4895_v56, %s4183_s15  ;;  %v1539_v42 = vadd.f32 %v1538_v39, %v4835_v62  ;;  %v1750_v0 = vmax.f32 %v1537_v8, 0.0 }
 0x18a   : > { %v1540_v63 = vpop.f32.mrf.mxu0 }
 0x18b   : > { %v1541_v16 = vadd.f32 %v1540_v63, %v4723_v43  ;;  %v1751_v22 = vmax.f32 %v1539_v42, 0.0 }
 0x18c   : > { %v1544_v9 = vpop.f32.mrf.mxu0 }
 0x18d   : > { %v1545_v11 = vadd.f32 %v1544_v9, %v4835_v62  ;;  %v1752_v19 = vmax.f32 %v1541_v16, 0.0 }
 0x18e   : > { %v1546_v13 = vpop.f32.mrf.mxu0 }
 0x18f   : > { %v1547_v57 = vadd.f32 %v1546_v13, %v4723_v43  ;;  %v1753_v17 = vmax.f32 %v1545_v11, 0.0 }
 0x190   : > { %v1548_v14 = vpop.f32.mrf.mxu0 }
 0x191   : > { %v1754_v18 = vmax.f32 %v1547_v57, 0.0  ;;  %v1549_v20 = vadd.f32 %v1548_v14, %v4835_v62  ;;  %v1837_v27 = vadd.f32 %v1753_v17, %v1749_v21 }
 0x192   : > { %v1550_v58 = vpop.f32.mrf.mxu0 }
 0x193   : > { %v1838_v47 = vadd.f32 %v1754_v18, %v1750_v0  ;;  %v1755_v23 = vmax.f32 %v1549_v20, 0.0  ;;  %v1551_v24 = vadd.f32 %v1550_v58, %v4723_v43 }
 0x194   : > { %v1554_v26 = vpop.f32.mrf.mxu0 }
 0x195   : > { %v1839_v30 = vadd.f32 %v1755_v23, %v1751_v22  ;;  %v1756_v31 = vmax.f32 %v1551_v24, 0.0  ;;  %v1555_v34 = vadd.f32 %v1554_v26, %v4835_v62  ;;  %v4080_v26 = vld [vmem:[%s5749_s3 + $0xf8] sm:$0xff]  }
 0x196   : > { %v1556_v33 = vpop.f32.mrf.mxu0  ;;  %3812 = vmatprep.subr.bf16.mxu1 %v4080_v26 }
 0x197   : > { %v1840_v28 = vadd.f32 %v1756_v31, %v1752_v19  ;;  %v4909_v35 = vpack.c.bf16 %v1839_v30, %v1837_v27  ;;  %v1557_v41 = vadd.f32 %v1556_v33, %v4723_v43  ;;  %v1757_v54 = vmax.f32 %v1555_v34, 0.0 }
 0x198   : > { %v1558_v38 = vpop.f32.mrf.mxu0 }
 0x199   : > { %v4911_v60 = vpack.c.bf16 %v1840_v28, %v1838_v47  ;;  %1921 = vrot.lane.b32.xlu1 %v4909_v35, %s4183_s15  ;;  %v1559_v48 = vadd.f32 %v1558_v38, %v4835_v62  ;;  %v1758_v61 = vmax.f32 %v1557_v41, 0.0 }
 0x19a   : > { %v1560_v40 = vpop.f32.mrf.mxu0 }
 0x19b   : > { %v1561_v50 = vadd.f32 %v1560_v40, %v4723_v43  ;;  %v1759_v2 = vmax.f32 %v1559_v48, 0.0 }
 0x19c   : > { %v1564_v44 = vpop.f32.mrf.mxu0 }
 0x19d   : > { %v1565_v45 = vadd.f32 %v1564_v44, %v4835_v62  ;;  %v1760_v5 = vmax.f32 %v1561_v50, 0.0 }
 0x19e   : > { %v1566_v46 = vpop.f32.mrf.mxu0 }
 0x19f   : > { %v1567_v49 = vadd.f32 %v1566_v46, %v4723_v43  ;;  %v1761_v55 = vmax.f32 %v1565_v45, 0.0 }
 0x1a0   : > { %v1568_v36 = vpop.f32.mrf.mxu0 }
 0x1a1   : > { %v1762_v51 = vmax.f32 %v1567_v49, 0.0  ;;  %v1569_v52 = vadd.f32 %v1568_v36, %v4835_v62  ;;  %v1841_v6 = vadd.f32 %v1761_v55, %v1757_v54 }
 0x1a2   : > { %v1570_v1 = vpop.f32.mrf.mxu0 }
 0x1a3   : > { %v1842_v3 = vadd.f32 %v1762_v51, %v1758_v61  ;;  %v1763_v32 = vmax.f32 %v1569_v52, 0.0  ;;  %v1571_v4 = vadd.f32 %v1570_v1, %v4723_v43 }
 0x1a4   : > { %v1574_v37 = vpop.f32.mrf.mxu0 }
 0x1a5   : > { %v1843_v39 = vadd.f32 %v1763_v32, %v1759_v2  ;;  %v1764_v63 = vmax.f32 %v1571_v4, 0.0  ;;  %v1575_v16 = vadd.f32 %v1574_v37, %v4835_v62 }
 0x1a6   : > { %v1576_v8 = vpop.f32.mrf.mxu0 }
 0x1a7   : > { %v4923_v9 = vpack.c.bf16 %v1843_v39, %v1841_v6  ;;  %v1844_v11 = vadd.f32 %v1764_v63, %v1760_v5  ;;  %v1577_v57 = vadd.f32 %v1576_v8, %v4723_v43  ;;  %v1765_v19 = vmax.f32 %v1575_v16, 0.0 }
 0x1a8   : > { %v1578_v12 = vpop.f32.mrf.mxu0 }
 0x1a9   : > { %v4925_v13 = vpack.c.bf16 %v1844_v11, %v1842_v3  ;;  %1925 = vrot.lane.b32.xlu0 %v4923_v9, %s4183_s15  ;;  %v1579_v18 = vadd.f32 %v1578_v12, %v4835_v62  ;;  %v1766_v21 = vmax.f32 %v1577_v57, 0.0 }
 0x1aa   : > { %v1580_v42 = vpop.f32.mrf.mxu0 }
 0x1ab   : > { %v1581_v22 = vadd.f32 %v1580_v42, %v4723_v43  ;;  %v1767_v30 = vmax.f32 %v1579_v18, 0.0 }
 0x1ac   : > { %v1584_v0 = vpop.f32.mrf.mxu0 }
 0x1ad   : > { %v1585_v14 = vadd.f32 %v1584_v0, %v4835_v62  ;;  %v1768_v40 = vmax.f32 %v1581_v22, 0.0 }
 0x1ae   : > { %v1586_v17 = vpop.f32.mrf.mxu0 }
 0x1af   : > { %v1587_v20 = vadd.f32 %v1586_v17, %v4723_v43  ;;  %v1769_v47 = vmax.f32 %v1585_v14, 0.0 }
 0x1b0   : > { %v1588_v58 = vpop.f32.mrf.mxu0 }
 0x1b1   : > { %v1770_v23 = vmax.f32 %v1587_v20, 0.0  ;;  %v1589_v24 = vadd.f32 %v1588_v58, %v4835_v62  ;;  %v1845_v41 = vadd.f32 %v1769_v47, %v1765_v19 }
 0x1b2   : > { %v1590_v27 = vpop.f32.mrf.mxu0 }
 0x1b3   : > { %v1846_v31 = vadd.f32 %v1770_v23, %v1766_v21  ;;  %v1771_v33 = vmax.f32 %v1589_v24, 0.0  ;;  %v1591_v28 = vadd.f32 %v1590_v27, %v4723_v43 }
 0x1b4   : > { %v1594_v38 = vpop.f32.mrf.mxu0 }
 0x1b5   : > { %v1847_v44 = vadd.f32 %v1771_v33, %v1767_v30  ;;  %v1772_v45 = vmax.f32 %v1591_v28, 0.0  ;;  %v1595_v52 = vadd.f32 %v1594_v38, %v4835_v62 }
 0x1b6   : > { %v1596_v34 = vpop.f32.mrf.mxu0 }
 0x1b7   : > { %v4940_v46 = vpack.c.bf16 %v1847_v44, %v1845_v41  ;;  %v1848_v48 = vadd.f32 %v1772_v45, %v1768_v40  ;;  %v1597_v50 = vadd.f32 %v1596_v34, %v4723_v43  ;;  %v1773_v39 = vmax.f32 %v1595_v52, 0.0 }
 0x1b8   : > { %v1598_v49 = vpop.f32.mrf.mxu0 }
 0x1b9   : > { %v4942_v61 = vpack.c.bf16 %v1848_v48, %v1846_v31  ;;  %1929 = vrot.lane.b32.xlu1 %v4940_v46, %s4183_s15  ;;  %v1599_v1 = vadd.f32 %v1598_v49, %v4835_v62  ;;  %v1774_v3 = vmax.f32 %v1597_v50, 0.0 }
 0x1ba   : > { %v1600_v36 = vpop.f32.mrf.mxu0 }
 0x1bb   : > { %v1601_v4 = vadd.f32 %v1600_v36, %v4723_v43  ;;  %v1775_v8 = vmax.f32 %v1599_v1, 0.0 }
 0x1bc   : > { %v1604_v55 = vpop.f32.mrf.mxu0 }
 0x1bd   : > { %v1605_v51 = vadd.f32 %v1604_v55, %v4835_v62  ;;  %v1776_v0 = vmax.f32 %v1601_v4, 0.0 }
 0x1be   : > { %v1606_v54 = vpop.f32.mrf.mxu0 }
 0x1bf   : > { %v1607_v2 = vadd.f32 %v1606_v54, %v4723_v43  ;;  %v1777_v37 = vmax.f32 %v1605_v51, 0.0 }
 0x1c0   : > { %v1608_v32 = vpop.f32.mrf.mxu0 }
 0x1c1   : > { %v1778_v5 = vmax.f32 %v1607_v2, 0.0  ;;  %v1609_v6 = vadd.f32 %v1608_v32, %v4835_v62  ;;  %v1849_v14 = vadd.f32 %v1777_v37, %v1773_v39 }
 0x1c2   : > { %v1610_v63 = vpop.f32.mrf.mxu0 }
 0x1c3   : > { %v1850_v11 = vadd.f32 %v1778_v5, %v1774_v3  ;;  %v1779_v12 = vmax.f32 %v1609_v6, 0.0  ;;  %v1611_v42 = vadd.f32 %v1610_v63, %v4723_v43 }
 0x1c4   : > { %v1614_v57 = vpop.f32.mrf.mxu0 }
 0x1c5   : > { %v1851_v16 = vadd.f32 %v1779_v12, %v1775_v8  ;;  %v1780_v17 = vmax.f32 %v1611_v42, 0.0  ;;  %v1615_v19 = vadd.f32 %v1614_v57, %v4835_v62 }
 0x1c6   : > { %v1616_v18 = vpop.f32.mrf.mxu0 }
 0x1c7   : > { %v4954_v20 = vpack.c.bf16 %v1851_v16, %v1849_v14  ;;  %v1852_v21 = vadd.f32 %v1780_v17, %v1776_v0  ;;  %v1617_v23 = vadd.f32 %v1616_v18, %v4723_v43  ;;  %v1781_v45 = vmax.f32 %v1615_v19, 0.0 }
 0x1c8   : > { %v1618_v58 = vpop.f32.mrf.mxu0 }
 0x1c9   : > { %v4956_v22 = vpack.c.bf16 %v1852_v21, %v1850_v11  ;;  %1933 = vrot.lane.b32.xlu0 %v4954_v20, %s4183_s15  ;;  %v1619_v30 = vadd.f32 %v1618_v58, %v4835_v62  ;;  %v1782_v33 = vmax.f32 %v1617_v23, 0.0 }
 0x1ca   : > { %v1620_v47 = vpop.f32.mrf.mxu0 }
 0x1cb   : > { %v1621_v38 = vadd.f32 %v1620_v47, %v4723_v43  ;;  %v1783_v48 = vmax.f32 %v1619_v30, 0.0 }
 0x1cc   : > { %v1624_v24 = vpop.f32.mrf.mxu0 }
 0x1cd   : > { %v1625_v26 = vadd.f32 %v1624_v24, %v4835_v62  ;;  %v1784_v51 = vmax.f32 %v1621_v38, 0.0 }
 0x1ce   : > { %v1626_v27 = vpop.f32.mrf.mxu0 }
 0x1cf   : > { %v1627_v31 = vadd.f32 %v1626_v27, %v4723_v43  ;;  %v1785_v40 = vmax.f32 %v1625_v26, 0.0 }
 0x1d0   : > { %v1628_v28 = vpop.f32.mrf.mxu0 }
 0x1d1   : > { %v1786_v41 = vmax.f32 %v1627_v31, 0.0  ;;  %v1629_v44 = vadd.f32 %v1628_v28, %v4835_v62  ;;  %v1853_v52 = vadd.f32 %v1785_v40, %v1781_v45 }
 0x1d2   : > { %v1630_v34 = vpop.f32.mrf.mxu0 }
 0x1d3   : > { %v1854_v49 = vadd.f32 %v1786_v41, %v1782_v33  ;;  %v1787_v36 = vmax.f32 %v1629_v44, 0.0  ;;  %v1631_v50 = vadd.f32 %v1630_v34, %v4723_v43 }
 0x1d4   : > { %v1634_v55 = vpop.f32.mrf.mxu0 }
 0x1d5   : > { %v1855_v54 = vadd.f32 %v1787_v36, %v1783_v48  ;;  %v1788_v1 = vmax.f32 %v1631_v50, 0.0  ;;  %v1635_v8 = vadd.f32 %v1634_v55, %v4835_v62 }
 0x1d6   : > { %v4968_v2 = vpop.f32.mrf.mxu0 }
 0x1d7   : > { %v4970_v3 = vpack.c.bf16 %v1855_v54, %v1853_v52  ;;  %v1856_v32 = vadd.f32 %v1788_v1, %v1784_v51  ;;  %v1789_v14 = vmax.f32 %v1635_v8, 0.0  ;;  %v4088_v8 = vld [vmem:[%s5749_s3 + $0xd8] sm:$0xff]  }
 0x1d8   : > { %v1638_v4 = vpop.f32.mrf.mxu0 }
 0x1d9   : > { %v4972_v37 = vpack.c.bf16 %v1856_v32, %v1854_v49  ;;  %1937 = vrot.lane.b32.xlu1 %v4970_v3, %s4183_s15  ;;  %v1639_v11 = vadd.f32 %v1638_v4, %v4835_v62  ;;  %v4081_v32 = vld [vmem:[%s5749_s3 + $0xb8] sm:$0xff]   ;;  %v4082_v4 = vld [vmem:[%s5749_s3 + $0xf0] sm:$0xff]  }
 0x1da   : > { %v4976_v5 = vpop.f32.mrf.mxu0 }
 0x1db   : > { %v1791_v16 = vmax.f32 %v1639_v11, 0.0 }
 0x1dc   : > { %v1644_v6 = vpop.f32.mrf.mxu0 }
 0x1dd   : > { %v1645_v39 = vadd.f32 %v1644_v6, %v4835_v62 }
 0x1de   : > { %v4979_v63 = vpop.f32.mrf.mxu0 }
 0x1df   : > { %v1793_v42 = vmax.f32 %v1645_v39, 0.0  ;;  %v4087_v39 = vld [vmem:[%s5749_s3 + $0xa0] sm:$0xff]  }
 0x1e0   : > { %v1648_v12 = vpop.f32.mrf.mxu0 }
 0x1e1   : > { %v1649_v57 = vadd.f32 %v1648_v12, %v4835_v62  ;;  %v1857_v21 = vadd.f32 %v1793_v42, %v1789_v14  ;;  %v4090_v14 = vld [vmem:[%s5749_s3 + $0xd0] sm:$0xff]  }
 0x1e2   : > { %v4984_v0 = vpop.f32.mrf.mxu0 }
 0x1e3   : > { %v1795_v17 = vmax.f32 %v1649_v57, 0.0  ;;  %v4089_v57 = vld [vmem:[%s5749_s3 + $0x98] sm:$0xff]  }
 0x1e4   : > { %v1654_v18 = vpop.f32.mrf.mxu0 }
 0x1e5   : > { %v1859_v58 = vadd.f32 %v1795_v17, %v1791_v16  ;;  %v1655_v31 = vadd.f32 %v1654_v18, %v4835_v62  ;;  %v4091_v16 = vld [vmem:[%s5749_s3 + $0x90] sm:$0xff]   ;;  %v1651_v17 = vadd.f32 %v4984_v0, %v4723_v43  ;;  %v1641_v18 = vadd.f32 %v4976_v5, %v4723_v43 }
 0x1e6   : > { %v4986_v47 = vpop.f32.mrf.mxu0  ;;  %v1637_v0 = vadd.f32 %v4968_v2, %v4723_v43  ;;  %v4095_v2 = vld [vmem:[%s5749_s3 + $0x80] sm:$0xff]  }
 0x1e7   : > { %v4988_v23 = vpack.c.bf16 %v1859_v58, %v1857_v21  ;;  %v1797_v44 = vmax.f32 %v1655_v31, 0.0  ;;  %v4093_v58 = vld [vmem:[%s5749_s3 + $0x88] sm:$0xff]   ;;  %v1796_v5 = vmax.f32 %v1651_v17, 0.0 }
 0x1e8   : > { %v1658_v24 = vpop.f32.mrf.mxu0 }
 0x1e9   : > { %1941 = vrot.lane.b32.xlu0 %v4988_v23, %s4183_s15  ;;  %v1659_v33 = vadd.f32 %v1658_v24, %v4835_v62  ;;  %v1647_v24 = vadd.f32 %v4979_v63, %v4723_v43 }
 0x1ea   : > { %v4992_v26 = vpop.f32.mrf.mxu0 }
 0x1eb   : > { %v1799_v45 = vmax.f32 %v1659_v33, 0.0 }
 0x1ec   : > { %v1664_v19 = vpop.f32.mrf.mxu0 }
 0x1ed   : > { %v1665_v27 = vadd.f32 %v1664_v19, %v4835_v62  ;;  %1960 = vrot.lane.b32.xlu0 %v4909_v35, %s4184_s25  ;;  %v4094_v19 = vld [vmem:[%s5749_s3 + $0xc0] sm:$0xff]  }
 0x1ee   : > { %v4997_v30 = vpop.f32.mrf.mxu0 }
 0x1ef   : > { %v1801_v38 = vmax.f32 %v1665_v27, 0.0 }
 0x1f0   : > { %v1668_v28 = vpop.f32.mrf.mxu0 }
 0x1f1   : > { %v1669_v40 = vadd.f32 %v1668_v28, %v4835_v62  ;;  %1919 = vrot.lane.b32.xlu0 %v4897_v7, %s4183_s15  ;;  %v1861_v49 = vadd.f32 %v1801_v38, %v1797_v44  ;;  %v1792_v28 = vmax.f32 %v1641_v18, 0.0  ;;  %v1790_v44 = vmax.f32 %v1637_v0, 0.0 }
 0x1f2   : > { %v5004_v41 = vpop.f32.mrf.mxu0 }
 0x1f3   : > { %v1803_v34 = vmax.f32 %v1669_v40, 0.0  ;;  %v1794_v40 = vmax.f32 %v1647_v24, 0.0 }
 0x1f4   : > { %v5006_v48 = vpop.f32.mrf.mxu0 }
 0x1f5   : > { %v1863_v36 = vadd.f32 %v1803_v34, %v1799_v45  ;;  %1964 = vrot.lane.b32.xlu0 %v4923_v9, %s4184_s25  ;;  %v1675_v27 = vadd.f32 %v5006_v48, %v4835_v62  ;;  %v1860_v45 = vadd.f32 %v1796_v5, %v1792_v28  ;;  %v1671_v34 = vadd.f32 %v5004_v41, %v4723_v43 }
 0x1f6   : > { %v5010_v50 = vpop.f32.mrf.mxu0  ;;  %v1667_v41 = vadd.f32 %v4997_v30, %v4723_v43 }
 0x1f7   : > { %v5012_v55 = vpack.c.bf16 %v1863_v36, %v1861_v49  ;;  %v1805_v48 = vmax.f32 %v1675_v27, 0.0 }
 0x1f8   : > { %v5014_v51 = vpop.f32.mrf.mxu0 }
 0x1f9   : > { %1945 = vrot.lane.b32.xlu1 %v5012_v55, %s4183_s15  ;;  %1923 = vrot.lane.b32.xlu0 %v4911_v60, %s4183_s15  ;;  %v1679_v63 = vadd.f32 %v5014_v51, %v4835_v62 }
 0x1fa   : > { %v5027_v1 = vpop.f32.mrf.mxu0 }
 0x1fb   : > { %v5020_v52 = vpop.permute.xlu0 %1917  ;;  %v1807_v49 = vmax.f32 %v1679_v63, 0.0  ;;  %v1681_v17 = vadd.f32 %v5027_v1, %v4723_v43 }
 0x1fc   : > { %v2090_v54 = vsel %vm1949_vm6, %v1878_v53, %v5020_v52  ;;  %v1684_v10 = vpop.f32.mrf.mxu0  ;;  %v4084_v53 = vld [vmem:[%s5749_s3 + $0xe8] sm:$0xff]  }
 0x1fd   : > { %1962 = vrot.lane.b32.xlu1 %v4911_v60, %s4184_s25  ;;  %1968 = vrot.lane.b32.xlu0 %v4940_v46, %s4184_s25  ;;  %v1685_v31 = vadd.f32 %v1684_v10, %v4835_v62  ;;  %v1858_v10 = vadd.f32 %v1794_v40, %v1790_v44 }
 0x1fe   : > { %2643 = vmatprep.mubr.bf16.mxu1 %v2090_v54  ;;  %v5052_v15 = vpop.f32.mrf.mxu0 }
 0x1ff   : > { %2644 = vmatmul.mubr.bf16.vlgmr.msra.gmra.mxu1 %v1877_v29  ;;  %v4086_v29 = vld [vmem:[%s5749_s3 + $0xe0] sm:$0xff]   ;;  %v1809_v36 = vmax.f32 %v1685_v31, 0.0 }
 0x200   : > { %3813 = vmatpush3.bf16.msra.mxu1 %v4081_v32  ;;  %v1688_v6 = vpop.f32.mrf.mxu0 }
 0x201   : > { %2003 = vrot.lane.b32.xlu1 %v4923_v9, %s4185_s30  ;;  %1927 = vrot.lane.b32.xlu0 %v4925_v13, %s4183_s15  ;;  %v1689_v33 = vadd.f32 %v1688_v6, %v4835_v62 }
 0x202   : > { %3814 = vmatprep.subr.bf16.mxu1 %v4082_v4  ;;  %v5079_v42 = vpop.f32.mrf.mxu0 }
 0x203   : > { %v1811_v51 = vmax.f32 %v1689_v33, 0.0  ;;  %v1691_v18 = vadd.f32 %v5079_v42, %v4723_v43 }
 0x204   : > { %3815 = vmatpush3.bf16.msra.mxu1 %v4083_v59  ;;  %v1661_v59 = vadd.f32 %v4992_v26, %v4723_v43  ;;  %v1865_v26 = vadd.f32 %v1809_v36, %v1805_v48 }
 0x205   : > { %1966 = vrot.lane.b32.xlu1 %v4925_v13, %s4184_s25  ;;  %1972 = vrot.lane.b32.xlu0 %v4954_v20, %s4184_s25  ;;  %v1867_v6 = vadd.f32 %v1811_v51, %v1807_v49 }
 0x206   : > { %3816 = vmatprep.subr.bf16.mxu1 %v4084_v53  ;;  %v1657_v53 = vadd.f32 %v4986_v47, %v4723_v43 }
 0x208   : > { %3817 = vmatpush3.bf16.msra.mxu1 %v4085_v25  ;;  %v4186_v25 = vmov 0   ;;  %v1798_v47 = vmax.f32 %v1657_v53, 0.0 }
 0x209   : > { %2007 = vrot.lane.b32.xlu1 %v4940_v46, %s4185_s30  ;;  %1931 = vrot.lane.b32.xlu0 %v4942_v61, %s4183_s15 }
 0x20a   : > { %3818 = vmatprep.subr.bf16.mxu1 %v4086_v29  ;;  %v1804_v29 = vmax.f32 %v1671_v34, 0.0 }
 0x20b   : > { %v5074_v11 = vpop.permute.xlu1 %1921 }
 0x20c   : > { %v2094_v12 = vsel %vm1949_vm6, %v4897_v7, %v5074_v11  ;;  %3819 = vmatpush3.bf16.msra.mxu1 %v4087_v39  ;;  %v5092_v7 = vpop.f32.mrf.mxu0  ;;  %v1800_v39 = vmax.f32 %v1661_v59, 0.0 }
 0x20d   : > { %1970 = vrot.lane.b32.xlu1 %v4942_v61, %s4184_s25  ;;  %1976 = vrot.lane.b32.xlu0 %v4970_v3, %s4184_s25  ;;  %v1695_v1 = vadd.f32 %v5092_v7, %v4835_v62 }
 0x20e   : > { %2651 = vmatprep.mubr.bf16.mxu1 %v2094_v12  ;;  %3820 = vmatprep.subr.bf16.mxu1 %v4088_v8  ;;  %v5108_v21 = vpop.f32.mrf.mxu0  ;;  %v1802_v8 = vmax.f32 %v1667_v41, 0.0  ;;  %v1864_v12 = vadd.f32 %v1804_v29, %v1800_v39 }
 0x20f   : > { %2652 = vmatmul.mubr.bf16.gmra.mxu1 %v4895_v56  ;;  %v4092_v56 = vld [vmem:[%s5749_s3 + $0xc8] sm:$0xff]   ;;  %v1697_v29 = vadd.f32 %v5108_v21, %v4723_v43 }
 0x210   : > { %3821 = vmatpush3.bf16.msra.mxu1 %v4089_v57  ;;  %v1698_v38 = vpop.f32.mrf.mxu0  ;;  %v5164_v57 = vpack.c.bf16 %v1867_v6, %v1865_v26 }
 0x211   : > { %2011 = vrot.lane.b32.xlu1 %v4954_v20, %s4185_s30  ;;  %1935 = vrot.lane.b32.xlu0 %v4956_v22, %s4183_s15 }
 0x212   : > { %3822 = vmatprep.subr.bf16.mxu1 %v4090_v14  ;;  %v5141_v32 = vpop.f32.mrf.mxu0 }
 0x214   : > { %3823 = vmatpush3.bf16.msra.mxu1 %v4091_v16  ;;  %v1704_v30 = vpop.f32.mrf.mxu0  ;;  %v1862_v16 = vadd.f32 %v1802_v8, %v1798_v47 }
 0x215   : > { %1974 = vrot.lane.b32.xlu1 %v4956_v22, %s4184_s25  ;;  %1980 = vrot.lane.b32.xlu0 %v4988_v23, %s4184_s25  ;;  %v1705_v42 = vadd.f32 %v1704_v30, %v4835_v62 }
 0x216   : > { %3824 = vmatprep.subr.bf16.mxu1 %v4092_v56  ;;  %v5166_v14 = vpop.f32.mrf.mxu0  ;;  %v1687_v56 = vadd.f32 %v5052_v15, %v4723_v43  ;;  %v1699_v15 = vadd.f32 %v1698_v38, %v4835_v62 }
 0x217   : > { %v1817_v44 = vmax.f32 %v1705_v42, 0.0 }
 0x218   : > { %3825 = vmatpush3.bf16.msra.mxu1 %v4093_v58  ;;  %v5180_v58 = vpack.c.bf16 %v1864_v12, %v1862_v16  ;;  %v1708_v24 = vpop.f32.mrf.mxu0  ;;  %v1810_v5 = vmax.f32 %v1687_v56, 0.0  ;;  %v1815_v40 = vmax.f32 %v1699_v15, 0.0 }
 0x219   : > { %2015 = vrot.lane.b32.xlu1 %v4970_v3, %s4185_s30  ;;  %1939 = vrot.lane.b32.xlu0 %v4972_v37, %s4183_s15  ;;  %v1709_v27 = vadd.f32 %v1708_v24, %v4835_v62 }
 0x21a   : > { %3826 = vmatprep.subr.bf16.mxu1 %v4094_v19  ;;  %v1812_v19 = vmax.f32 %v1691_v18, 0.0  ;;  %v1710_v31 = vpop.f32.mrf.mxu0 }
 0x21b   : > { %v5139_v54 = vpop.permute.xlu0 %1925  ;;  %v1711_v26 = vadd.f32 %v1710_v31, %v4723_v43 }
 0x21c   : > { %v2098_v4 = vsel %vm1949_vm6, %v4911_v60, %v5139_v54  ;;  %3827 = vmatpush3.bf16.msra.mxu1 %v4095_v2  ;;  %v5157_v60 = vpack.c.bf16 %v1860_v45, %v1858_v10  ;;  %v1714_v38 = vpop.f32.mrf.mxu0  ;;  %v1813_v2 = vmax.f32 %v1695_v1, 0.0  ;;  %v1819_v45 = vmax.f32 %v1709_v27, 0.0 }
 0x21d   : > { %1978 = vrot.lane.b32.xlu1 %v4972_v37, %s4184_s25  ;;  %1984 = vrot.lane.b32.xlu0 %v5012_v55, %s4184_s25  ;;  %v1715_v6 = vadd.f32 %v1714_v38, %v4835_v62  ;;  %v1820_v12 = vmax.f32 %v1711_v26, 0.0  ;;  %v4098_v26 = vld [vmem:[%s5749_s3 + $0x128] sm:$0xff]  }
 0x21e   : > { %2659 = vmatprep.mubr.bf16.mxu1 %v2098_v4  ;;  %2805 = vmatprep.subr.bf16.mxu1 %v4186_v25  ;;  %v1716_v34 = vpop.f32.mrf.mxu0  ;;  %v1871_v49 = vadd.f32 %v1819_v45, %v1815_v40 }
 0x21f   : > { %2660 = vmatmul.mubr.bf16.gmra.mxu1 %v4909_v35  ;;  %v1677_v35 = vadd.f32 %v5010_v50, %v4723_v43  ;;  %v1808_v50 = vmax.f32 %v1681_v17, 0.0 }
 0x220   : > { %v1718_v36 = vpop.f32.mrf.mxu0 }
 0x221   : > { %2019 = vrot.lane.b32.xlu1 %v4988_v23, %s4185_s30  ;;  %1943 = vrot.lane.b32.xlu0 %v5157_v60, %s4183_s15  ;;  %v1806_v0 = vmax.f32 %v1677_v35, 0.0  ;;  %v1868_v28 = vadd.f32 %v1812_v19, %v1808_v50  ;;  %v1719_v30 = vadd.f32 %v1718_v36, %v4835_v62  ;;  %v1821_v35 = vmax.f32 %v1715_v6, 0.0 }
 0x222   : > { %v1720_v51 = vpop.f32.mrf.mxu0  ;;  %v1717_v19 = vadd.f32 %v1716_v34, %v4723_v43 }
 0x223   : > { %v1866_v7 = vadd.f32 %v1810_v5, %v1806_v0  ;;  %v1823_v17 = vmax.f32 %v1719_v30, 0.0 }
 0x224   : > { %v1724_v59 = vpop.f32.mrf.mxu0  ;;  %v1822_v27 = vmax.f32 %v1717_v19, 0.0 }
 0x225   : > { %1982 = vrot.lane.b32.xlu1 %v5157_v60, %s4184_s25  ;;  %1988 = vrot.lane.b32.xlu0 %v5164_v57, %s4184_s25  ;;  %v5205_v48 = vpack.c.bf16 %v1868_v28, %v1866_v7  ;;  %v1725_v21 = vadd.f32 %v1724_v59, %v4835_v62  ;;  %v4109_v59 = vld [vmem:[%s5751_s5 + $0xf8] sm:$0xff]  }
 0x226   : > { %v1726_v41 = vpop.f32.mrf.mxu0  ;;  %3898 = vmatprep.subr.bf16.mxu0 %v4109_v59 }
 0x227   : > { %v1825_v56 = vmax.f32 %v1725_v21, 0.0  ;;  %v1727_v1 = vadd.f32 %v1726_v41, %v4723_v43  ;;  %v4110_v41 = vld [vmem:[%s5751_s5 + $0xb8] sm:$0xff]  }
 0x228   : > { %v1728_v53 = vpop.f32.mrf.mxu0  ;;  %3899 = vmatpush3.bf16.msra.mxu0 %v4110_v41  ;;  %v4113_v41 = vld [vmem:[%s5751_s5 + $0xe8] sm:$0xff]  }
 0x229   : > { %2023 = vrot.lane.b32.xlu1 %v5012_v55, %s4185_s30  ;;  %1947 = vrot.lane.b32.xlu0 %v5180_v58, %s4183_s15  ;;  %s4187_s15 = smov 64   ;;  %v1729_v39 = vadd.f32 %v1728_v53, %v4835_v62 }
 0x22a   : > { %v1730_v5 = vpop.f32.mrf.mxu0 }
 0x22b   : > { %v5191_v63 = vpop.permute.xlu1 %1929  ;;  %v1827_v62 = vmax.f32 %v1729_v39, 0.0  ;;  %v1731_v15 = vadd.f32 %v1730_v5, %v4723_v43  ;;  %v4099_v39 = vld [vmem:[%s5749_s3 + $0x120] sm:$0xff]  }
 0x22c   : > { %v2102_v33 = vsel %vm1949_vm6, %v4925_v13, %v5191_v63 }
 0x22d   : > { %1986 = vrot.lane.b32.xlu1 %v5180_v58, %s4184_s25  ;;  %2005 = vrot.lane.b32.xlu0 %v4925_v13, %s4185_s30  ;;  %v1869_v13 = vadd.f32 %v1817_v44, %v1813_v2  ;;  %v1875_v0 = vadd.f32 %v1827_v62, %v1823_v17  ;;  %v4101_v62 = vld [vmem:[%s5749_s3 + $0x110] sm:$0xff]  }
 0x22e   : > { %2667 = vmatprep.mubr.bf16.mxu1 %v2102_v33  ;;  %v1826_v33 = vmax.f32 %v1727_v1, 0.0 }
 0x22f   : > { %2668 = vmatmul.mubr.bf16.gmra.mxu1 %v4923_v9  ;;  %v5211_v9 = vpack.c.bf16 %v1871_v49, %v1869_v13 }
 0x231   : > { %2027 = vrot.lane.b32.xlu1 %v5164_v57, %s4185_s30  ;;  %2048 = vrot.lane.b32.xlu0 %v4942_v61, %s4187_s15 }
 0x235   : > { %1990 = vrot.lane.b32.xlu1 %v5205_v48, %s4184_s25  ;;  %2050 = vrot.lane.b32.xlu0 %v4954_v20, %s4187_s15 }
 0x239   : > { %2031 = vrot.lane.b32.xlu1 %v5211_v9, %s4185_s30  ;;  %2013 = vrot.lane.b32.xlu0 %v4956_v22, %s4185_s30 }
 0x23b   : > { %v5217_v4 = vpop.permute.xlu0 %1933 }
 0x23c   : > { %v2106_v10 = vsel %vm1949_vm6, %v4942_v61, %v5217_v4 }
 0x23d   : > { %2046 = vrot.lane.b32.xlu1 %v4940_v46, %s4187_s15  ;;  %2056 = vrot.lane.b32.xlu0 %v4972_v37, %s4187_s15 }
 0x23e   : > { %2675 = vmatprep.mubr.bf16.mxu1 %v2106_v10 }
 0x23f   : > { %2676 = vmatmul.mubr.bf16.gmra.mxu1 %v4940_v46  ;;  %v1701_v46 = vadd.f32 %v5141_v32, %v4723_v43  ;;  %v1814_v32 = vmax.f32 %v1697_v29, 0.0 }
 0x241   : > { %2009 = vrot.lane.b32.xlu1 %v4942_v61, %s4185_s30  ;;  %2058 = vrot.lane.b32.xlu0 %v4988_v23, %s4187_s15  ;;  %v1707_v61 = vadd.f32 %v5166_v14, %v4723_v43  ;;  %v1816_v8 = vmax.f32 %v1701_v46, 0.0 }
 0x243   : > { %v1818_v47 = vmax.f32 %v1707_v61, 0.0  ;;  %v1872_v24 = vadd.f32 %v1820_v12, %v1816_v8 }
 0x245   : > { %2052 = vrot.lane.b32.xlu1 %v4956_v22, %s4187_s15  ;;  %2021 = vrot.lane.b32.xlu0 %v5157_v60, %s4185_s30  ;;  %v1870_v18 = vadd.f32 %v1818_v47, %v1814_v32 }
 0x247   : > { %v1898_v50 = vpack.c.bf16 %v1872_v24, %v1870_v18 }
 0x249   : > { %2054 = vrot.lane.b32.xlu1 %v4970_v3, %s4187_s15  ;;  %2064 = vrot.lane.b32.xlu0 %v5180_v58, %s4187_s15 }
 0x24b   : > { %v5250_v14 = vpop.permute.xlu1 %1937 }
 0x24c   : > { %v2110_v16 = vsel %vm1949_vm6, %v4956_v22, %v5250_v14  ;;  %v1873_v22 = vadd.f32 %v1825_v56, %v1821_v35 }
 0x24d   : > { %2017 = vrot.lane.b32.xlu1 %v4972_v37, %s4185_s30  ;;  %2066 = vrot.lane.b32.xlu0 %v5164_v57, %s4187_s15 }
 0x24e   : > { %2683 = vmatprep.mubr.bf16.mxu1 %v2110_v16  ;;  %v1899_v57 = vpack.c.bf16 %v1875_v0, %v1873_v22  ;;  %v4100_v16 = vld [vmem:[%s5749_s3 + $0x118] sm:$0xff]  }
 0x24f   : > { %2684 = vmatmul.mubr.bf16.gmra.mxu1 %v4954_v20  ;;  %v1721_v20 = vadd.f32 %v1720_v51, %v4723_v43  ;;  %v1874_v43 = vadd.f32 %v1826_v33, %v1822_v27 }
 0x251   : > { %2060 = vrot.lane.b32.xlu1 %v5157_v60, %s4187_s15  ;;  %2029 = vrot.lane.b32.xlu0 %v5205_v48, %s4185_s30  ;;  %v1824_v31 = vmax.f32 %v1721_v20, 0.0  ;;  %v4103_v20 = vld [vmem:[%s5749_s3 + $0x100] sm:$0xff]  }
 0x255   : > { %2062 = vrot.lane.b32.xlu1 %v5012_v55, %s4187_s15  ;;  %2072 = vrot.lane.b32.xlu0 %v1898_v50, %s4187_s15 }
 0x259   : > { %2025 = vrot.lane.b32.xlu1 %v5180_v58, %s4185_s30  ;;  %2074 = vrot.lane.b32.xlu0 %v1899_v57, %s4187_s15  ;;  %v1828_v58 = vmax.f32 %v1731_v15, 0.0 }
 0x25b   : > { %v5274_v42 = vpop.permute.xlu0 %1941  ;;  %v1876_v28 = vadd.f32 %v1828_v58, %v1824_v31  ;;  %v4104_v31 = vld [vmem:[%s5749_s3 + $0x160] sm:$0xff]   ;;  %v4111_v58 = vld [vmem:[%s5751_s5 + $0xf0] sm:$0xff]  }
 0x25c   : > { %v2114_v55 = vsel %vm1949_vm6, %v4972_v37, %v5274_v42  ;;  %3900 = vmatprep.subr.bf16.mxu0 %v4111_v58 }
 0x25d   : > { %2068 = vrot.lane.b32.xlu1 %v5205_v48, %s4187_s15  ;;  %2691 = vmatprep.mubr.bf16.mxu1 %v2114_v55  ;;  %v1900_v2 = vpack.c.bf16 %v1876_v28, %v1874_v43  ;;  %v4105_v28 = vld [vmem:[%s5749_s3 + $0x158] sm:$0xff]  }
 0x25e   : > { %2692 = vmatmul.mubr.bf16.gmra.mxu1 %v4970_v3 }
 0x25f   : > { %v1961_v7 = vpop.permute.xlu0 %1960 }
 0x261   : > { %2070 = vrot.lane.b32.xlu1 %v5211_v9, %s4187_s15  ;;  %v4096_v9 = vld [vmem:[%s5749_s3 + $0x138] sm:$0xff]  }
 0x263   : > { %v1920_v38 = vpop.permute.xlu0 %1919 }
 0x264   : > { %v1950_v48 = vsel %vm1949_vm6, %v5020_v52, %v1920_v38  ;;  %v4097_v52 = vld [vmem:[%s5749_s3 + $0x130] sm:$0xff]  }
 0x265   : > { %2033 = vrot.lane.b32.xlu1 %v1898_v50, %s4185_s30  ;;  %v4102_v50 = vld [vmem:[%s5749_s3 + $0x108] sm:$0xff]   ;;  %v4112_v38 = vld [vmem:[%s5751_s5 + $0xb0] sm:$0xff]  }
 0x266   : > { %3901 = vmatpush3.bf16.msra.mxu0 %v4112_v38 }
 0x267   : > { %v1965_v37 = vpop.permute.xlu0 %1964  ;;  %3902 = vmatprep.subr.bf16.mxu0 %v4113_v41 }
 0x269   : > { %2076 = vrot.lane.b32.xlu1 %v1900_v2, %s4187_s15  ;;  %s3568_s15 = sshll.u32 %s5762_s13, 3 }
 0x26a   : > { %s651_s23 = scalar_lea.vmem %s5757_s11, %s3568_s15 }
 0x26b   : > { %v5286_v40 = vpop.permute.xlu1 %1945  ;;  %v1924_v44 = vpop.permute.xlu0 %1923 }
 0x26c   : > { %v2118_v3 = vsel %vm1949_vm6, %v5157_v60, %v5286_v40  ;;  %v1951_v53 = vsel %vm1949_vm6, %v5074_v11, %v1924_v44 }
 0x26d   : > { %2699 = vmatprep.mubr.bf16.mxu1 %v2118_v3  ;;  %v2127_v11 = vsel %vm1992_vm8, %v1951_v53, %v1965_v37  ;;  %v4114_v53 = vld [vmem:[%s5751_s5 + $0xa8] sm:$0xff]  }
 0x26e   : > { %2700 = vmatmul.mubr.bf16.gmra.mxu1 %v4988_v23  ;;  %v2123_v23 = vsel %vm1992_vm8, %v1950_v48, %v1961_v7  ;;  %3903 = vmatpush3.bf16.msra.mxu0 %v4114_v53 }
 0x26f   : > { %v1963_v45 = vpop.permute.xlu1 %1962  ;;  %v1969_v34 = vpop.permute.xlu0 %1968 }
 0x270   : > { %v1993_v13 = vsel %vm1992_vm8, %v1961_v7, %v1963_v45  ;;  %v4106_v45 = vld [vmem:[%s5749_s3 + $0x150] sm:$0xff]  }
 0x273   : > { %v5295_v49 = vpop.permute.xlu1 %2003  ;;  %v1928_v36 = vpop.permute.xlu0 %1927 }
 0x274   : > { %v2156_v60 = vsel %vm2035_vm7, %v1993_v13, %v5295_v49  ;;  %v1952_v32 = vsel %vm1949_vm6, %v5139_v54, %v1928_v36  ;;  %v4107_v13 = vld [vmem:[%s5749_s3 + $0x148] sm:$0xff]  }
 0x275   : > { %2740 = vmatprep.mubr.bf16.mxu1 %v2156_v60  ;;  %v2131_v17 = vsel %vm1992_vm8, %v1952_v32, %v1969_v34 }
 0x276   : > { %2741 = vmatmul.mubr.bf16.vlgmr.msra.gmra.mxu1 %v2123_v23 }
 0x277   : > { %2806 = vmatpush1.bf16.msra.mxu1 %v4096_v9  ;;  %v1967_v51 = vpop.permute.xlu1 %1966  ;;  %v1973_v10 = vpop.permute.xlu0 %1972 }
 0x278   : > { %2807 = vmatprep.subr.bf16.mxu1 %v4186_v25  ;;  %v1994_v29 = vsel %vm1992_vm8, %v1965_v37, %v1967_v51  ;;  %v4108_v51 = vld [vmem:[%s5749_s3 + $0x140] sm:$0xff]  }
 0x27b   : > { %v5316_v46 = vpop.permute.xlu1 %2007  ;;  %v1932_v61 = vpop.permute.xlu0 %1931  ;;  %2808 = vmatpush1.bf16.msra.mxu1 %v4097_v52 }
 0x27c   : > { %v2160_v6 = vsel %vm2035_vm7, %v1994_v29, %v5316_v46  ;;  %2809 = vmatprep.subr.bf16.mxu1 %v4186_v25  ;;  %v1953_v18 = vsel %vm1949_vm6, %v5191_v63, %v1932_v61 }
 0x27d   : > { %2748 = vmatprep.mubr.bf16.mxu1 %v2160_v6  ;;  %v2135_v5 = vsel %vm1992_vm8, %v1953_v18, %v1973_v10 }
 0x27e   : > { %2749 = vmatmul.mubr.bf16.gmra.mxu1 %v2127_v11 }
 0x27f   : > { %v1971_v30 = vpop.permute.xlu1 %1970  ;;  %v1977_v21 = vpop.permute.xlu0 %1976  ;;  %2810 = vmatpush1.bf16.msra.mxu1 %v4098_v26 }
 0x280   : > { %2811 = vmatprep.subr.bf16.mxu1 %v4186_v25  ;;  %v1995_v8 = vsel %vm1992_vm8, %v1969_v34, %v1971_v30 }
 0x283   : > { %v5332_v47 = vpop.permute.xlu1 %2011  ;;  %v1936_v12 = vpop.permute.xlu0 %1935  ;;  %2812 = vmatpush1.bf16.msra.mxu1 %v4099_v39 }
 0x284   : > { %v2164_v35 = vsel %vm2035_vm7, %v1995_v8, %v5332_v47  ;;  %2813 = vmatprep.subr.bf16.mxu1 %v4186_v25  ;;  %v1954_v1 = vsel %vm1949_vm6, %v5217_v4, %v1936_v12 }
 0x285   : > { %2756 = vmatprep.mubr.bf16.mxu1 %v2164_v35  ;;  %v2139_v4 = vsel %vm1992_vm8, %v1954_v1, %v1977_v21 }
 0x286   : > { %2757 = vmatmul.mubr.bf16.gmra.mxu1 %v2131_v17 }
 0x287   : > { %v1975_v54 = vpop.permute.xlu1 %1974  ;;  %v1981_v56 = vpop.permute.xlu0 %1980  ;;  %2814 = vmatpush1.bf16.msra.mxu1 %v4100_v16 }
 0x288   : > { %2815 = vmatprep.subr.bf16.mxu1 %v4186_v25  ;;  %v1996_v24 = vsel %vm1992_vm8, %v1973_v10, %v1975_v54 }
 0x28b   : > { %v5348_v22 = vpop.permute.xlu1 %2015  ;;  %v1940_v0 = vpop.permute.xlu0 %1939  ;;  %2816 = vmatpush1.bf16.msra.mxu1 %v4101_v62 }
 0x28c   : > { %v2168_v57 = vsel %vm2035_vm7, %v1996_v24, %v5348_v22  ;;  %2817 = vmatprep.subr.bf16.mxu1 %v4186_v25  ;;  %v1955_v2 = vsel %vm1949_vm6, %v5250_v14, %v1940_v0 }
 0x28d   : > { %2764 = vmatprep.mubr.bf16.mxu1 %v2168_v57  ;;  %v2143_v48 = vsel %vm1992_vm8, %v1955_v2, %v1981_v56  ;;  %v4115_v57 = vld [vmem:[%s5751_s5 + $0xe0] sm:$0xff]  }
 0x28e   : > { %2765 = vmatmul.mubr.bf16.gmra.mxu1 %v2135_v5  ;;  %3904 = vmatprep.subr.bf16.mxu0 %v4115_v57 }
 0x28f   : > { %v1979_v63 = vpop.permute.xlu1 %1978  ;;  %v1985_v19 = vpop.permute.xlu0 %1984  ;;  %2818 = vmatpush1.bf16.msra.mxu1 %v4102_v50 }
 0x290   : > { %2819 = vmatprep.subr.bf16.mxu1 %v4186_v25  ;;  %v1997_v15 = vsel %vm1992_vm8, %v1977_v21, %v1979_v63 }
 0x293   : > { %v5364_v55 = vpop.permute.xlu1 %2019  ;;  %v1944_v27 = vpop.permute.xlu0 %1943  ;;  %2820 = vmatpush1.bf16.msra.mxu1 %v4103_v20 }
 0x294   : > { %v2172_v33 = vsel %vm2035_vm7, %v1997_v15, %v5364_v55  ;;  %2827 = vmatprep.subr.bf16.mxu1 %v4186_v25  ;;  %v1956_v9 = vsel %vm1949_vm6, %v5274_v42, %v1944_v27  ;;  %v4116_v15 = vld [vmem:[%s5751_s5 + $0xa0] sm:$0xff]  }
 0x295   : > { %2772 = vmatprep.mubr.bf16.mxu1 %v2172_v33  ;;  %v2147_v52 = vsel %vm1992_vm8, %v1956_v9, %v1985_v19  ;;  %3905 = vmatpush3.bf16.msra.mxu0 %v4116_v15  ;;  %v4128_v15 = vld [vmem:[%s5751_s5 + $0x20] sm:$0xff]  }
 0x296   : > { %2773 = vmatmul.mubr.bf16.gmra.mxu1 %v2139_v4 }
 0x297   : > { %v1983_v7 = vpop.permute.xlu1 %1982  ;;  %v1989_v43 = vpop.permute.xlu0 %1988  ;;  %2828 = vmatpush2.bf16.msra.mxu1 %v4104_v31 }
 0x298   : > { %2829 = vmatprep.subr.bf16.mxu1 %v4186_v25  ;;  %v1998_v37 = vsel %vm1992_vm8, %v1981_v56, %v1983_v7 }
 0x29b   : > { %v5386_v44 = vpop.permute.xlu1 %2023  ;;  %v1948_v3 = vpop.permute.xlu0 %1947  ;;  %2830 = vmatpush2.bf16.msra.mxu1 %v4105_v28 }
 0x29c   : > { %v2176_v34 = vsel %vm2035_vm7, %v1998_v37, %v5386_v44  ;;  %2831 = vmatprep.subr.bf16.mxu1 %v4186_v25  ;;  %v1957_v29 = vsel %vm1949_vm6, %v5286_v40, %v1948_v3 }
 0x29d   : > { %2780 = vmatprep.mubr.bf16.mxu1 %v2176_v34  ;;  %v2151_v11 = vsel %vm1992_vm8, %v1957_v29, %v1989_v43 }
 0x29e   : > { %2781 = vmatmul.mubr.bf16.gmra.mxu1 %v2143_v48 }
 0x29f   : > { %v1987_v14 = vpop.permute.xlu1 %1986  ;;  %2832 = vmatpush2.bf16.msra.mxu1 %v4106_v45  ;;  %v2006_v36 = vpop.permute.xlu0 %2005 }
 0x2a0   : > { %2833 = vmatprep.subr.bf16.mxu1 %v4186_v25  ;;  %v1999_v60 = vsel %vm1992_vm8, %v1985_v19, %v1987_v14  ;;  %v2036_v32 = vsel %vm2035_vm7, %v5295_v49, %v2006_v36 }
 0x2a3   : > { %v5402_v23 = vpop.permute.xlu1 %2027  ;;  %2834 = vmatpush2.bf16.msra.mxu1 %v4107_v13  ;;  %v2049_v59 = vpop.permute.xlu0 %2048 }
 0x2a4   : > { %v2180_v10 = vsel %vm2035_vm7, %v1999_v60, %v5402_v23  ;;  %2835 = vmatprep.subr.bf16.mxu1 %v4186_v25 }
 0x2a5   : > { %2788 = vmatprep.mubr.bf16.mxu1 %v2180_v10 }
 0x2a6   : > { %2789 = vmatmul.mubr.bf16.gmra.mxu1 %v2147_v52 }
 0x2a7   : > { %v1991_v42 = vpop.permute.xlu1 %1990  ;;  %2836 = vmatpush2.bf16.msra.mxu1 %v4108_v51  ;;  %v2051_v26 = vpop.permute.xlu0 %2050  ;;  %v4117_v51 = vld [vmem:[%s5751_s5 + $0xd8] sm:$0xff]  }
 0x2a8   : > { %v2000_v25 = vsel %vm1992_vm8, %v1989_v43, %v1991_v42  ;;  %3906 = vmatprep.subr.bf16.mxu0 %v4117_v51 }
 0x2ab   : > { %v5420_v61 = vpop.permute.xlu1 %2031  ;;  %v2014_v40 = vpop.permute.xlu0 %2013 }
 0x2ac   : > { %v2184_v6 = vsel %vm2035_vm7, %v2000_v25, %v5420_v61  ;;  %v2038_v63 = vsel %vm2035_vm7, %v5332_v47, %v2014_v40 }
 0x2ad   : > { %2796 = vmatprep.mubr.bf16.mxu1 %v2184_v6 }
 0x2ae   : > { %2797 = vmatmul.mubr.bf16.gmra.mxu1 %v2151_v11 }
 0x2af   : > { %v2047_v30 = vpop.permute.xlu1 %2046  ;;  %v2057_v16 = vpop.permute.xlu0 %2056 }
 0x2b0   : > { %v2079_v21 = vsel %vm2078_vm9, %v2047_v30, %v2049_v59  ;;  %v2189_v8 = vsel %vm2078_vm9, %v2036_v32, %v2047_v30  ;;  %v4118_v59 = vld [vmem:[%s5751_s5 + $0x98] sm:$0xff]  }
 0x2b1   : > { %3686 = vmatprep.mubr.msk.bf16.mxu1 %vm2586_vm10, %v2079_v21  ;;  %3907 = vmatpush3.bf16.msra.mxu0 %v4118_v59  ;;  %v4140_v59 = vld [vmem:[%s5751_s5 + $0x80] sm:$0xff]  }
 0x2b3   : > { %v2010_v39 = vpop.permute.xlu1 %2009  ;;  %v2059_v62 = vpop.permute.xlu0 %2058 }
 0x2b4   : > { %v2037_v17 = vsel %vm2035_vm7, %v5316_v46, %v2010_v39 }
 0x2b5   : > { %v2193_v56 = vsel %vm2078_vm9, %v2037_v17, %v2051_v26 }
 0x2b6   : > { %2838 = vmatmul.mubr.bf16.vlgmr.msra.gmra.mxu1 %v2189_v8 }
 0x2b7   : > { %v2053_v12 = vpop.permute.xlu1 %2052  ;;  %v2022_v19 = vpop.permute.xlu0 %2021 }
 0x2b8   : > { %v2080_v35 = vsel %vm2078_vm9, %v2051_v26, %v2053_v12  ;;  %v2040_v34 = vsel %vm2035_vm7, %v5364_v55, %v2022_v19 }
 0x2b9   : > { %3687 = vmatprep.mubr.msk.bf16.mxu1 %vm2586_vm10, %v2080_v35 }
 0x2bb   : > { %v2055_v54 = vpop.permute.xlu1 %2054  ;;  %v2065_v58 = vpop.permute.xlu0 %2064 }
 0x2bc   : > { %v2081_v18 = vsel %vm2078_vm9, %v2055_v54, %v2057_v16  ;;  %v2197_v1 = vsel %vm2078_vm9, %v2038_v63, %v2055_v54  ;;  %v4119_v16 = vld [vmem:[%s5751_s5 + $0xd0] sm:$0xff]   ;;  %v4126_v63 = vld [vmem:[%s5751_s5 + $0x28] sm:$0xff]  }
 0x2bd   : > { %3908 = vmatprep.subr.bf16.mxu0 %v4119_v16  ;;  %v4120_v54 = vld [vmem:[%s5751_s5 + $0x90] sm:$0xff]  }
 0x2be   : > { %2846 = vmatmul.mubr.bf16.gmra.mxu1 %v2193_v56  ;;  %3909 = vmatpush3.bf16.msra.mxu0 %v4120_v54 }
 0x2bf   : > { %v3764_v49 = vpop.f32.mrf.mxu1  ;;  %v2018_v24 = vpop.permute.xlu1 %2017  ;;  %3688 = vmatprep.mubr.msk.bf16.mxu1 %vm2586_vm10, %v2081_v18 }
 0x2c0   : > { %v2039_v47 = vsel %vm2035_vm7, %v5348_v22, %v2018_v24  ;;  %v2067_v38 = vpop.permute.xlu0 %2066  ;;  %v4124_v24 = vld [vmem:[%s5751_s5 + $0x30] sm:$0xff]  }
 0x2c1   : > { %v3765_v0 = vpop.f32.mrf.mxu1  ;;  %v2201_v7 = vsel %vm2078_vm9, %v2039_v47, %v2059_v62  ;;  %v4131_v47 = vld [vmem:[%s5751_s5 + $0x88] sm:$0xff]  }
 0x2c2   : > { %v5437_v50 = vadd.f32 %v3765_v0, %v3764_v49  ;;  %v4123_v49 = vld [vmem:[%s5751_s5 + $0x70] sm:$0xff]  }
 0x2c3   : > { %v3767_v5 = vpop.f32.mrf.mxu1  ;;  %v2061_v46 = vpop.permute.xlu1 %2060 }
 0x2c4   : > { %v2082_v27 = vsel %vm2078_vm9, %v2059_v62, %v2061_v46  ;;  %v2030_v36 = vpop.permute.xlu0 %2029  ;;  %v4122_v62 = vld [vmem:[%s5751_s5 + $0x38] sm:$0xff]   ;;  %v4125_v46 = vld [vmem:[%s5751_s5 + $0x68] sm:$0xff]  }
 0x2c5   : > { %v3768_v20 = vpop.f32.mrf.mxu1  ;;  %v2042_v26 = vsel %vm2035_vm7, %v5402_v23, %v2030_v36 }
 0x2c6   : > { %v5449_v31 = vadd.f32 %v3768_v20, %v3767_v5  ;;  %2854 = vmatmul.mubr.bf16.gmra.mxu1 %v2197_v1  ;;  %v4127_v1 = vld [vmem:[%s5751_s5 + $0x60] sm:$0xff]  }
 0x2c7   : > { %v2063_v33 = vpop.permute.xlu1 %2062  ;;  %3689 = vmatprep.mubr.msk.bf16.mxu1 %vm2586_vm10, %v2082_v27  ;;  %v4130_v27 = vld [vmem:[%s5751_s5 + $0x58] sm:$0xff]  }
 0x2c8   : > { %v2083_v43 = vsel %vm2078_vm9, %v2063_v33, %v2065_v58  ;;  %v2205_v22 = vsel %vm2078_vm9, %v2040_v34, %v2063_v33  ;;  %v2073_v55 = vpop.permute.xlu0 %2072  ;;  %v4132_v33 = vld [vmem:[%s5751_s5 + $0x18] sm:$0xff]   ;;  %v4129_v58 = vld [vmem:[%s5751_s5 + $0xc8] sm:$0xff]  }
 0x2c9   : > { %3910 = vmatprep.subr.bf16.mxu0 %v4129_v58 }
 0x2ca   : > { %3911 = vmatpush3.bf16.msra.mxu0 %v4131_v47 }
 0x2cb   : > { %v2026_v4 = vpop.permute.xlu1 %2025 }
 0x2cc   : > { %v2041_v60 = vsel %vm2035_vm7, %v5386_v44, %v2026_v4  ;;  %v2075_v6 = vpop.permute.xlu0 %2074 }
 0x2cd   : > { %v2209_v52 = vsel %vm2078_vm9, %v2041_v60, %v2067_v38 }
 0x2ce   : > { %2862 = vmatmul.mubr.bf16.gmra.mxu1 %v2201_v7  ;;  %v4133_v7 = vld [vmem:[%s5751_s5 + $0x50] sm:$0xff]  }
 0x2cf   : > { %v3770_v28 = vpop.f32.mrf.mxu1  ;;  %3690 = vmatprep.mubr.msk.bf16.mxu1 %vm2586_vm10, %v2083_v43  ;;  %v2069_v2 = vpop.permute.xlu1 %2068  ;;  %v4134_v43 = vld [vmem:[%s5751_s5 + $0x10] sm:$0xff]  }
 0x2d0   : > { %v2084_v14 = vsel %vm2078_vm9, %v2067_v38, %v2069_v2 }
 0x2d1   : > { %v3771_v37 = vpop.f32.mrf.mxu1 }
 0x2d2   : > { %v5457_v3 = vadd.f32 %v3771_v37, %v3770_v28  ;;  %v4135_v37 = vld [vmem:[%s5751_s5 + $0x48] sm:$0xff]  }
 0x2d3   : > { %v3773_v45 = vpop.f32.mrf.mxu1  ;;  %v2071_v9 = vpop.permute.xlu1 %2070 }
 0x2d4   : > { %v2085_v42 = vsel %vm2078_vm9, %v2071_v9, %v2073_v55  ;;  %v2213_v30 = vsel %vm2078_vm9, %v2042_v26, %v2071_v9 }
 0x2d5   : > { %v3774_v48 = vpop.f32.mrf.mxu1 }
 0x2d6   : > { %v5463_v13 = vadd.f32 %v3774_v48, %v3773_v45  ;;  %2870 = vmatmul.mubr.bf16.gmra.mxu1 %v2205_v22  ;;  %v4136_v45 = vld [vmem:[%s5751_s5 + $0x8] sm:$0xff]   ;;  %v4137_v22 = vld [vmem:[%s5751_s5 + $0x40] sm:$0xff]  }
 0x2d7   : > { %3691 = vmatprep.mubr.msk.bf16.mxu1 %vm2586_vm10, %v2084_v14  ;;  %v2034_v10 = vpop.permute.xlu1 %2033  ;;  %v4138_v14 = vld [vmem:[%s5751_s5] sm:$0xff]  }
 0x2d8   : > { %v2043_v39 = vsel %vm2035_vm7, %v5420_v61, %v2034_v10  ;;  %v4121_v61 = vld [vmem:[%s5751_s5 + $0x78] sm:$0xff]  }
 0x2d9   : > { %v2217_v32 = vsel %vm2078_vm9, %v2043_v39, %v2075_v6  ;;  %3876 = vmatprep.subr.bf16.mxu1 %v4121_v61 }
 0x2da   : > { %3877 = vmatpush3.bf16.msra.mxu1 %v4122_v62 }
 0x2db   : > { %v2077_v29 = vpop.permute.xlu1 %2076  ;;  %3878 = vmatprep.subr.bf16.mxu1 %v4123_v49 }
 0x2dc   : > { %v2086_v21 = vsel %vm2078_vm9, %v2075_v6, %v2077_v29  ;;  %v5578_v6 = vld [vmem:[%s5750_s4] ss:$0 sm:$0xff] }
 0x2dd   : > { %v2649_v16 = vadd.f32 %v5449_v31, %v5578_v6  ;;  %v2654_v62 = vadd.f32 %v5457_v3, %v5578_v6 }
 0x2de   : > { %2878 = vmatmul.mubr.bf16.gmra.mxu1 %v2209_v52  ;;  %v4139_v52 = vld [vmem:[%s5751_s5 + $0xc0] sm:$0xff]  }
 0x2df   : > { %v3776_v41 = vpop.f32.mrf.mxu1  ;;  %3692 = vmatprep.mubr.msk.bf16.mxu1 %vm2586_vm10, %v2085_v42  ;;  %3879 = vmatpush3.bf16.msra.mxu1 %v4124_v24 }
 0x2e0   : > { %3880 = vmatprep.subr.bf16.mxu1 %v4125_v46  ;;  %3912 = vmatprep.subr.bf16.mxu0 %v4139_v52 }
 0x2e1   : > { %v3777_v44 = vpop.f32.mrf.mxu1  ;;  %3913 = vmatpush3.bf16.msra.mxu0 %v4140_v59 }
 0x2e2   : > { %v5477_v53 = vadd.f32 %v3777_v44, %v3776_v41 }
 0x2e3   : > { %v3779_v25 = vpop.f32.mrf.mxu1  ;;  %3881 = vmatpush3.bf16.msra.mxu1 %v4126_v63 }
 0x2e4   : > { %3882 = vmatprep.subr.bf16.mxu1 %v4127_v1 }
 0x2e5   : > { %v3780_v11 = vpop.f32.mrf.mxu1 }
 0x2e6   : > { %v5483_v40 = vadd.f32 %v3780_v11, %v3779_v25  ;;  %2886 = vmatmul.mubr.bf16.gmra.mxu1 %v2213_v30 }
 0x2e7   : > { %3693 = vmatprep.mubr.msk.bf16.mxu1 %vm2586_vm10, %v2086_v21  ;;  %3883 = vmatpush3.bf16.msra.mxu1 %v4128_v15  ;;  %v2646_v21 = vadd.f32 %v5437_v50, %v5578_v6 }
 0x2e8   : > { %3884 = vmatprep.subr.bf16.mxu1 %v4130_v27 }
 0x2eb   : > { %3885 = vmatpush3.bf16.msra.mxu1 %v4132_v33  ;;  %v2665_v33 = vadd.f32 %v5483_v40, %v5578_v6 }
 0x2ec   : > { %3886 = vmatprep.subr.bf16.mxu1 %v4133_v7 }
 0x2ee   : > { %2894 = vmatmul.mubr.bf16.gmra.mxu1 %v2217_v32 }
 0x2ef   : > { %v3782_v8 = vpop.f32.mrf.mxu1  ;;  %3887 = vmatpush3.bf16.msra.mxu1 %v4134_v43 }
 0x2f0   : > { %3888 = vmatprep.subr.bf16.mxu1 %v4135_v37 }
 0x2f1   : > { %v3783_v12 = vpop.f32.mrf.mxu1 }
 0x2f2   : > { %v5489_v23 = vadd.f32 %v3783_v12, %v3782_v8 }
 0x2f3   : > { %v3785_v35 = vpop.f32.mrf.mxu1  ;;  %3889 = vmatpush3.bf16.msra.mxu1 %v4136_v45 }
 0x2f4   : > { %3890 = vmatprep.subr.bf16.mxu1 %v4137_v22  ;;  %v2670_v7 = vadd.f32 %v5489_v23, %v5578_v6 }
 0x2f5   : > { %v3786_v17 = vpop.f32.mrf.mxu1 }
 0x2f6   : > { %v5497_v56 = vadd.f32 %v3786_v17, %v3785_v35 }
 0x2f7   : > { %3891 = vmatpush3.bf16.msra.mxu1 %v4138_v14 }
 0x2ff   : > { %v3788_v18 = vpop.f32.mrf.mxu1 }
 0x301   : > { %v3789_v0 = vpop.f32.mrf.mxu1 }
 0x302   : > { %v5511_v57 = vadd.f32 %v3789_v0, %v3788_v18  ;;  %v2657_v0 = vadd.f32 %v5463_v13, %v5578_v6 }
 0x303   : > { %v3791_v5 = vpop.f32.mrf.mxu1 }
 0x305   : > { %v3792_v19 = vpop.f32.mrf.mxu1 }
 0x306   : > { %v5519_v20 = vadd.f32 %v3792_v19, %v3791_v5  ;;  %v2662_v19 = vadd.f32 %v5477_v53, %v5578_v6 }
 0x30f   : > { %v3794_v4 = vpop.f32.mrf.mxu1 }
 0x311   : > { %v3795_v28 = vpop.f32.mrf.mxu1 }
 0x312   : > { %v5545_v38 = vadd.f32 %v3795_v28, %v3794_v4 }
 0x313   : > { %v3797_v2 = vpop.f32.mrf.mxu1 }
 0x314   : > { %v2686_v59 = vadd.f32 %v5545_v38, %v5578_v6 }
 0x315   : > { %v3798_v34 = vpop.f32.mrf.mxu1 }
 0x316   : > { %v5553_v48 = vadd.f32 %v3798_v34, %v3797_v2  ;;  %v2678_v34 = vadd.f32 %v5511_v57, %v5578_v6 }
 0x31e   : > { %v3800_v36 = vpop.f32.mrf.mxu1 }
 0x320   : > { %v3801_v9 = vpop.f32.mrf.mxu1 }
 0x321   : > { %v5561_v60 = vadd.f32 %v3801_v9, %v3800_v36  ;;  %v2681_v9 = vadd.f32 %v5519_v20, %v5578_v6 }
 0x322   : > { %v3803_v51 = vpop.f32.mrf.mxu1 }
 0x324   : > { %v3804_v55 = vpop.f32.mrf.mxu1 }
 0x325   : > { %v5563_v10 = vadd.f32 %v3804_v55, %v3803_v51 }
 0x32e   : > { %v3806_v42 = vpop.f32.mrf.mxu1 }
 0x330   : > { %v3807_v41 = vpop.f32.mrf.mxu1 }
 0x331   : > { %v5571_v44 = vadd.f32 %v3807_v41, %v3806_v42 }
 0x332   : > { %v3809_v29 = vpop.f32.mrf.mxu1 }
 0x334   : > { %v3810_v25 = vpop.f32.mrf.mxu1 }
 0x335   : > { %v5573_v26 = vadd.f32 %v3810_v25, %v3809_v29  ;;  %v2689_v25 = vadd.f32 %v5553_v48, %v5578_v6 }
 0x336   : > { %v3828_v11 = vpop.f32.mrf.mxu1 }
 0x338   : > { %v3829_v30 = vpop.f32.mrf.mxu1 }
 0x339   : > { %v3830_v39 = vadd.f32 %v3829_v30, %v3828_v11 }
 0x33a   : > { %v3831_v32 = vpop.f32.mrf.mxu1 }
 0x33b   : > { %v5582_v8 = vadd.f32 %v3830_v39, %v2646_v21  ;;  %v2694_v39 = vadd.f32 %v5561_v60, %v5578_v6 }
 0x33c   : > { %v3832_v12 = vpop.f32.mrf.mxu1 }
 0x33d   : > { %v3833_v35 = vadd.f32 %v3832_v12, %v3831_v32 }
 0x33e   : > { %v3834_v17 = vpop.f32.mrf.mxu1 }
 0x33f   : > { %v5586_v54 = vadd.f32 %v3833_v35, %v2649_v16  ;;  %v2697_v35 = vadd.f32 %v5563_v10, %v5578_v6 }
 0x340   : > { %v3835_v61 = vpop.f32.mrf.mxu1 }
 0x341   : > { %v3836_v18 = vadd.f32 %v3835_v61, %v3834_v17 }
 0x342   : > { %v3837_v49 = vpop.f32.mrf.mxu1 }
 0x343   : > { %v5590_v24 = vadd.f32 %v3836_v18, %v2654_v62  ;;  %v2702_v18 = vadd.f32 %v5571_v44, %v5578_v6 }
 0x344   : > { %v3838_v50 = vpop.f32.mrf.mxu1 }
 0x345   : > { %v3839_v5 = vadd.f32 %v3838_v50, %v3837_v49 }
 0x346   : > { %v3840_v46 = vpop.f32.mrf.mxu1 }
 0x347   : > { %v5594_v63 = vadd.f32 %v3839_v5, %v2657_v0 }
 0x348   : > { %v3841_v31 = vpop.f32.mrf.mxu1 }
 0x349   : > { %v3842_v1 = vadd.f32 %v3841_v31, %v3840_v46 }
 0x34a   : > { %v3843_v15 = vpop.f32.mrf.mxu1 }
 0x34b   : > { %v5598_v27 = vadd.f32 %v3842_v1, %v2662_v19 }
 0x34c   : > { %v3844_v3 = vpop.f32.mrf.mxu1 }
 0x34d   : > { %v3845_v58 = vadd.f32 %v3844_v3, %v3843_v15 }
 0x34e   : > { %v3846_v47 = vpop.f32.mrf.mxu1 }
 0x34f   : > { %v5602_v4 = vadd.f32 %v3845_v58, %v2665_v33 }
 0x350   : > { %v3847_v13 = vpop.f32.mrf.mxu1 }
 0x351   : > { %v3848_v43 = vadd.f32 %v3847_v13, %v3846_v47 }
 0x352   : > { %v5606_v28 = vpop.f32.mrf.mxu1 }
 0x353   : > { %v5608_v53 = vadd.f32 %v3848_v43, %v2670_v7 }
 0x354   : > { %v3850_v2 = vpop.f32.mrf.mxu1 }
 0x356   : > { %v3852_v37 = vpop.f32.mrf.mxu1 }
 0x358   : > { %v3853_v45 = vpop.f32.mrf.mxu1 }
 0x359   : > { %v3854_v40 = vadd.f32 %v3853_v45, %v3852_v37 }
 0x35a   : > { %v3855_v22 = vpop.f32.mrf.mxu1 }
 0x35b   : > { %v5612_v14 = vadd.f32 %v3854_v40, %v2678_v34 }
 0x35c   : > { %v3856_v36 = vpop.f32.mrf.mxu1 }
 0x35d   : > { %v3857_v23 = vadd.f32 %v3856_v36, %v3855_v22 }
 0x35e   : > { %v3858_v51 = vpop.f32.mrf.mxu1 }
 0x35f   : > { %v5616_v55 = vadd.f32 %v3857_v23, %v2681_v9 }
 0x360   : > { %v3859_v52 = vpop.f32.mrf.mxu1 }
 0x361   : > { %v3860_v42 = vadd.f32 %v3859_v52, %v3858_v51 }
 0x362   : > { %v3861_v41 = vpop.f32.mrf.mxu1 }
 0x363   : > { %v5620_v29 = vadd.f32 %v3860_v42, %v2686_v59 }
 0x364   : > { %v3862_v57 = vpop.f32.mrf.mxu1 }
 0x365   : > { %v3863_v11 = vadd.f32 %v3862_v57, %v3861_v41 }
 0x366   : > { %v3864_v30 = vpop.f32.mrf.mxu1 }
 0x367   : > { %v5624_v21 = vadd.f32 %v3863_v11, %v2689_v25 }
 0x368   : > { %v3865_v20 = vpop.f32.mrf.mxu1 }
 0x369   : > { %v3866_v32 = vadd.f32 %v3865_v20, %v3864_v30 }
 0x36a   : > { %v3867_v12 = vpop.f32.mrf.mxu1 }
 0x36b   : > { %v5628_v16 = vadd.f32 %v3866_v32, %v2694_v39 }
 0x36c   : > { %v3868_v38 = vpop.f32.mrf.mxu1 }
 0x36d   : > { %v3869_v17 = vadd.f32 %v3868_v38, %v3867_v12 }
 0x36e   : > { %v3870_v61 = vpop.f32.mrf.mxu1 }
 0x36f   : > { %v5632_v62 = vadd.f32 %v3869_v17, %v2697_v35 }
 0x370   : > { %v3871_v48 = vpop.f32.mrf.mxu1 }
 0x371   : > { %v3872_v49 = vadd.f32 %v3871_v48, %v3870_v61 }
 0x372   : > { %v5636_v50 = vpop.f32.mrf.mxu1 }
 0x373   : > { %v5638_v60 = vadd.f32 %v3872_v49, %v2702_v18 }
 0x374   : > { %v5640_v0 = vpop.f32.mrf.mxu1 }
 0x376   : > { %v2839_v5 = vpop.f32.mrf.mxu1 }
 0x377   : > { %v2840_v10 = vadd.f32 %v2839_v5, %v5582_v8 }
 0x378   : > { %v2841_v46 = vpop.f32.mrf.mxu1 }
 0x379   : > { %v2902_v33 = vmax.f32 %v2840_v10, 0.0 }
 0x37a   : > { %v2842_v31 = vpop.f32.mrf.mxu1 }
 0x37b   : > { %v2843_v44 = vadd.f32 %v2842_v31, %v5586_v54  ;;  %v2673_v54 = vadd.f32 %v5497_v56, %v5578_v6 }
 0x37c   : > { %v2844_v19 = vpop.f32.mrf.mxu1 }
 0x37d   : > { %v2903_v37 = vmax.f32 %v2843_v44, 0.0 }
 0x37e   : > { %v2847_v1 = vpop.f32.mrf.mxu1 }
 0x37f   : > { %v2848_v15 = vadd.f32 %v2847_v1, %v5590_v24  ;;  %v3851_v24 = vadd.f32 %v3850_v2, %v5606_v28 }
 0x380   : > { %v2849_v3 = vpop.f32.mrf.mxu1 }
 0x381   : > { %v2904_v58 = vmax.f32 %v2848_v15, 0.0  ;;  %v2770_v57 = vadd.f32 %v3851_v24, %v2673_v54  ;;  %v4144_v24 = vld [vmem:[%s5753_s7 + $0x20] sm:$0xff]   ;;  %v4147_v54 = vld [vmem:[%s5753_s7 + $0x8] sm:$0xff]  }
 0x382   : > { %v2850_v47 = vpop.f32.mrf.mxu1 }
 0x383   : > { %v2918_v13 = vadd.f32 %v2904_v58, %v2902_v33  ;;  %v2851_v7 = vadd.f32 %v2850_v47, %v5594_v63  ;;  %v2705_v47 = vadd.f32 %v5573_v26, %v5578_v6  ;;  %v4141_v26 = vld [vmem:[%s5753_s7 + $0x38] ss:$0 sps:$4 sm:$0xff]   ;;  %v4188_v6 = vmov 0.0  }
 0x384   : > { %v2852_v43 = vpop.f32.mrf.mxu1  ;;  %3936 = vmatprep.subr.bf16.mxu1 %v4188_v6  ;;  %3956 = vmatprep.subr.bf16.mxu0 %v4188_v6 }
 0x385   : > { %v2905_v45 = vmax.f32 %v2851_v7, 0.0 }
 0x386   : > { %v2855_v34 = vpop.f32.mrf.mxu1 }
 0x387   : > { %v2919_v40 = vadd.f32 %v2905_v45, %v2903_v37  ;;  %v2856_v23 = vadd.f32 %v2855_v34, %v5598_v27 }
 0x388   : > { %v2857_v22 = vpop.f32.mrf.mxu1 }
 0x389   : > { %v2926_v36 = vpack.c.bf16 %v2919_v40, %v2918_v13  ;;  %v2906_v59 = vmax.f32 %v2856_v23, 0.0  ;;  %v4145_v23 = vld [vmem:[%s5753_s7 + $0x18] sm:$0xff]  }
 0x38a   : > { %v2858_v8 = vpop.f32.mrf.mxu1 }
 0x38b   : > { %v2859_v42 = vadd.f32 %v2858_v8, %v5602_v4 }
 0x38c   : > { %v2860_v9 = vpop.f32.mrf.mxu1 }
 0x38d   : > { %v2907_v39 = vmax.f32 %v2859_v42, 0.0  ;;  %v4143_v9 = vld [vmem:[%s5753_s7 + $0x28] sm:$0xff]   ;;  %v4150_v42 = vld [vmem:[%s5755_s9 + $0x20] sm:$0xff]  }
 0x38e   : > { %v2863_v51 = vpop.f32.mrf.mxu1 }
 0x38f   : > { %v2864_v52 = vadd.f32 %v2863_v51, %v5608_v53  ;;  %v4146_v51 = vld [vmem:[%s5753_s7 + $0x10] sm:$0xff]  }
 0x390   : > { %v2865_v63 = vpop.f32.mrf.mxu1 }
 0x391   : > { %v2908_v41 = vmax.f32 %v2864_v52, 0.0  ;;  %v4148_v52 = vld [vmem:[%s5753_s7] sm:$0xff]   ;;  %v4149_v63 = vld [vmem:[%s5755_s9 + $0x28] ss:$0 sps:$4 sm:$0x33]  }
 0x392   : > { %v2866_v25 = vpop.f32.mrf.mxu1 }
 0x393   : > { %v2920_v11 = vadd.f32 %v2908_v41, %v2906_v59  ;;  %v2867_v30 = vadd.f32 %v2866_v25, %v2770_v57  ;;  %v3453_v59 = vsel %vm3451_vm13, %v4149_v63, 0  ;;  %v4151_v41 = vld [vmem:[%s5755_s9 + $0x18] sm:$0xff]  }
 0x394   : > { %v2868_v20 = vpop.f32.mrf.mxu1 }
 0x395   : > { %v2909_v28 = vmax.f32 %v2867_v30, 0.0 }
 0x396   : > { %v2871_v2 = vpop.f32.mrf.mxu1 }
 0x397   : > { %v2921_v27 = vadd.f32 %v2909_v28, %v2907_v39  ;;  %v2872_v53 = vadd.f32 %v2871_v2, %v5612_v14  ;;  %v3694_v28 = vld [vmem:[%s5752_s6] ss:$0 sm:$0xff] }
 0x398   : > { %v2873_v32 = vpop.f32.mrf.mxu1 }
 0x399   : > { %v2927_v12 = vpack.c.bf16 %v2921_v27, %v2920_v11  ;;  %v2910_v61 = vmax.f32 %v2872_v53, 0.0 }
 0x39a   : > { %v2874_v38 = vpop.f32.mrf.mxu1 }
 0x39b   : > { %3225 = vmatprep.mubr.bf16.mxu1 %v2927_v12  ;;  %v2875_v48 = vadd.f32 %v2874_v38, %v5616_v55 }
 0x39c   : > { %v2876_v56 = vpop.f32.mrf.mxu1  ;;  %3226 = vmatmul.mubr.bf16.vlgmr.msra.gmra.mxu1 %v2926_v36 }
 0x39d   : > { %v2911_v19 = vmax.f32 %v2875_v48, 0.0  ;;  %3952 = vmatprep.mubr.msk.bf16.mxu1 %vm4189_vm12, %v4188_v6 }
 0x39e   : > { %v2879_v35 = vpop.f32.mrf.mxu1 }
 0x39f   : > { %v2880_v4 = vadd.f32 %v2879_v35, %v5620_v29  ;;  %v3875_v29 = vadd.f32 %v5640_v0, %v5636_v50 }
 0x3a0   : > { %v2881_v17 = vpop.f32.mrf.mxu1 }
 0x3a1   : > { %v2912_v18 = vmax.f32 %v2880_v4, 0.0  ;;  %v2802_v45 = vadd.f32 %v3875_v29, %v2705_v47 }
 0x3a2   : > { %v2882_v49 = vpop.f32.mrf.mxu1 }
 0x3a3   : > { %v2922_v5 = vadd.f32 %v2912_v18, %v2910_v61  ;;  %v2883_v46 = vadd.f32 %v2882_v49, %v5624_v21  ;;  %v4152_v49 = vld [vmem:[%s5755_s9 + $0x10] sm:$0xff]  }
 0x3a4   : > { %v2884_v31 = vpop.f32.mrf.mxu1 }
 0x3a5   : > { %v2913_v10 = vmax.f32 %v2883_v46, 0.0  ;;  %v4154_v46 = vld [vmem:[%s5755_s9] sm:$0xff]  }
 0x3a6   : > { %v2887_v1 = vpop.f32.mrf.mxu1  ;;  %v3727_v31 = vld [vmem:[%s5754_s8] ss:$0 sm:$0xff] }
 0x3a7   : > { %v2923_v15 = vadd.f32 %v2913_v10, %v2911_v19  ;;  %v2888_v58 = vadd.f32 %v2887_v1, %v5628_v16 }
 0x3a8   : > { %v2889_v3 = vpop.f32.mrf.mxu1 }
 0x3a9   : > { %v2928_v33 = vpack.c.bf16 %v2923_v15, %v2922_v5  ;;  %v2914_v7 = vmax.f32 %v2888_v58, 0.0  ;;  %v4153_v5 = vld [vmem:[%s5755_s9 + $0x8] sm:$0xff]   ;;  %v3737_v58 = vld [vmem:[%s5756_s10] ss:$0 sm:$0xff] }
 0x3aa   : > { %v2890_v14 = vpop.f32.mrf.mxu1 }
 0x3ab   : > { %v2891_v43 = vadd.f32 %v2890_v14, %v5632_v62  ;;  %v3351_v62 = vsel %vm3349_vm11, %v4141_v26, 0 }
 0x3ac   : > { %v2892_v44 = vpop.f32.mrf.mxu1  ;;  %3937 = vmatpush3.bf16.msra.mxu1 %v3351_v62 }
 0x3ad   : > { %v2915_v8 = vmax.f32 %v2891_v43, 0.0  ;;  %3938 = vmatprep.subr.bf16.mxu1 %v4188_v6 }
 0x3ae   : > { %v2895_v55 = vpop.f32.mrf.mxu1 }
 0x3af   : > { %v2896_v21 = vadd.f32 %v2895_v55, %v5638_v60  ;;  %v4142_v60 = vld [vmem:[%s5753_s7 + $0x30] sm:$0xff]  }
 0x3b0   : > { %v2897_v13 = vpop.f32.mrf.mxu1  ;;  %3939 = vmatpush3.bf16.msra.mxu1 %v4142_v60 }
 0x3b1   : > { %v2916_v37 = vmax.f32 %v2896_v21, 0.0  ;;  %3940 = vmatprep.subr.bf16.mxu1 %v4188_v6 }
 0x3b2   : > { %v2898_v34 = vpop.f32.mrf.mxu1 }
 0x3b3   : > { %v2924_v40 = vadd.f32 %v2916_v37, %v2914_v7  ;;  %v2899_v22 = vadd.f32 %v2898_v34, %v2802_v45 }
 0x3b4   : > { %v2900_v36 = vpop.f32.mrf.mxu1  ;;  %3941 = vmatpush3.bf16.msra.mxu1 %v4143_v9 }
 0x3b5   : > { %v2917_v50 = vmax.f32 %v2899_v22, 0.0  ;;  %3942 = vmatprep.subr.bf16.mxu1 %v4188_v6 }
 0x3b7   : > { %v2925_v0 = vadd.f32 %v2917_v50, %v2915_v8 }
 0x3b8   : > { %3943 = vmatpush3.bf16.msra.mxu1 %v4144_v24 }
 0x3b9   : > { %v2929_v16 = vpack.c.bf16 %v2925_v0, %v2924_v40  ;;  %3944 = vmatprep.subr.bf16.mxu1 %v4188_v6 }
 0x3bb   : > { %3266 = vmatprep.mubr.bf16.mxu0 %v2929_v16 }
 0x3bc   : > { %3267 = vmatmul.mubr.bf16.vlgmr.msra.gmra.mxu0 %v2928_v33  ;;  %3945 = vmatpush3.bf16.msra.mxu1 %v4145_v23 }
 0x3bd   : > { %3946 = vmatprep.subr.bf16.mxu1 %v4188_v6  ;;  %3968 = vmatprep.mubr.msk.bf16.mxu0 %vm4189_vm12, %v4188_v6 }
 0x3be   : > { %3957 = vmatpush3.bf16.msra.mxu0 %v3453_v59 }
 0x3bf   : > { %3958 = vmatprep.subr.bf16.mxu0 %v4188_v6 }
 0x3c0   : > { %3947 = vmatpush3.bf16.msra.mxu1 %v4146_v51 }
 0x3c1   : > { %3948 = vmatprep.subr.bf16.mxu1 %v4188_v6 }
 0x3c2   : > { %3959 = vmatpush3.bf16.msra.mxu0 %v4150_v42 }
 0x3c3   : > { %3960 = vmatprep.subr.bf16.mxu0 %v4188_v6 }
 0x3c4   : > { %3949 = vmatpush3.bf16.msra.mxu1 %v4147_v54 }
 0x3c5   : > { %3950 = vmatprep.subr.bf16.mxu1 %v4188_v6 }
 0x3c6   : > { %3961 = vmatpush3.bf16.msra.mxu0 %v4151_v41 }
 0x3c7   : > { %3962 = vmatprep.subr.bf16.mxu0 %v4188_v6 }
 0x3c8   : > { %3951 = vmatpush3.bf16.msra.mxu1 %v4148_v52 }
 0x3ca   : > { %3963 = vmatpush3.bf16.msra.mxu0 %v4152_v49 }
 0x3cb   : > { %3964 = vmatprep.subr.bf16.mxu0 %v4188_v6 }
 0x3ce   : > { %3965 = vmatpush3.bf16.msra.mxu0 %v4153_v5 }
 0x3cf   : > { %3966 = vmatprep.subr.bf16.mxu0 %v4188_v6 }
 0x3d2   : > { %3967 = vmatpush3.bf16.msra.mxu0 %v4154_v46 }
 0x45c   : > { %v3892_v57 = vpop.f32.mrf.mxu1 }
 0x45e   : > { %v3893_v25 = vpop.f32.mrf.mxu1 }
 0x45f   : > { %v3894_v39 = vadd.f32 %v3893_v25, %v3892_v57 }
 0x460   : > { %v3895_v11 = vpop.f32.mrf.mxu1 }
 0x461   : > { %v3228_v38 = vadd.f32 %v3894_v39, %v3694_v28 }
 0x462   : > { %v3896_v30 = vpop.f32.mrf.mxu1 }
 0x463   : > { %v3897_v27 = vadd.f32 %v3896_v30, %v3895_v11 }
 0x465   : > { %v3231_v53 = vadd.f32 %v3897_v27, %v3694_v28 }
 0x47c   : > { %v3914_v20 = vpop.f32.mrf.mxu0 }
 0x47e   : > { %v3915_v2 = vpop.f32.mrf.mxu0 }
 0x47f   : > { %v3916_v32 = vadd.f32 %v3915_v2, %v3914_v20 }
 0x480   : > { %v3917_v12 = vpop.f32.mrf.mxu0 }
 0x481   : > { %v3269_v35 = vadd.f32 %v3916_v32, %v3228_v38 }
 0x482   : > { %v3918_v56 = vpop.f32.mrf.mxu0 }
 0x483   : > { %v3919_v4 = vadd.f32 %v3918_v56, %v3917_v12  ;;  %v3275_v61 = vmax.f32 %v3269_v35, 0.0 }
 0x485   : > { %v3272_v17 = vadd.f32 %v3919_v4, %v3231_v53 }
 0x487   : > { %v3276_v48 = vmax.f32 %v3272_v17, 0.0 }
 0x489   : > { %v3277_v18 = vpack.c.bf16 %v3276_v48, %v3275_v61 }
 0x48b   : > { %3953 = vmatmul.mubr.msk.bf16.vlgmr.msra.gmra.mxu1 %vm3345_vm14, %v3277_v18 }
 0x54b   : > { %v3387_v19 = vpop.f32.mrf.mxu1 }
 0x54c   : > { %v3388_v1 = vadd.f32 %v3727_v31, %v3387_v19 }
 0x54d   : > { %v3954_v10 = vpop.f32.mrf.mxu1 }
 0x54e   : > { %v3394_v14 = vmax.f32 %v3388_v1, 0.0 }
 0x54f   : > { %v3390_v15 = vpop.f32.mrf.mxu1 }
 0x550   : > { %v3391_v3 = vadd.f32 %v3727_v31, %v3390_v15 }
 0x551   : > { %v3955_v33 = vpop.f32.mrf.mxu1 }
 0x552   : > { %v3395_v44 = vmax.f32 %v3391_v3, 0.0 }
 0x554   : > { %v3396_v29 = vpack.c.bf16 %v3395_v44, %v3394_v14 }
 0x556   : > { %3969 = vmatmul.mubr.msk.bf16.vlgmr.msra.gmra.mxu0 %vm1164_vm4, %v3396_v29 }
 0x616   : > { %v3489_v55 = vpop.f32.mrf.mxu0 }
 0x617   : > { %v3490_v47 = vadd.f32 %v3737_v58, %v3489_v55 }
 0x618   : > { %v3970_v21 = vpop.f32.mrf.mxu0 }
 0x619   : > { %3496 = vst [vmem:[%s651_s23] sm:$0xff] %v3490_v47 }
 0x61a   : > { %v3492_v13 = vpop.f32.mrf.mxu0 }
 0x61b   : > { %v3493_v7 = vadd.f32 %v3737_v58, %v3492_v13 }
 0x61c   : > { %v3971_v43 = vpop.f32.mrf.mxu0 }
 0x61d   : > { %3497 = vst [vmem:[%s651_s23 + $0x8] sm:$0xff] %v3493_v7 }
 0x61e PF: > { %p18_p9 = scmp.ge.s32.totalorder %s4267_s21, 4   ;;  %s5758_s17 = smov %s4173_s18 }
 0x61f   : > { %s5759_s18 = smov %s4276_s24  ;;  %s5760_s19 = smov %s4267_s21 }
 0x620   :  { %20 = sbr.rel (!%p18_p9) target bundleno = 2 (0x2), region = 140 }

</bundles_post_ra>
